<compile_context>
chip_gen: v7x
topology: tpu7x:2x2x1
jax: 0.10.0
libtpu: 0.0.40
codegen_flags: <defaults>
</compile_context>

<pallas_src>
import functools
import math

import jax
import jax.numpy as jnp
from jax.experimental import pallas as pl
from jax.experimental.pallas import tpu as pltpu

LATENT = 32    # hypernetwork input width (fixed by nn.Linear(32, 256))
HIDDEN = 256   # hypernetwork hidden width


def fused_hyper_kernel(x_ref, w1, b1, w2, b2, w3, b3, w4, b4, w5, b5, out_ref):
    """One grid step j = one hypernetwork: 5-layer linear chain, no activations."""
    h = jnp.dot(x_ref[...], w1[0], preferred_element_type=jnp.float32) + b1[0]
    h = jnp.dot(h, w2[0], preferred_element_type=jnp.float32) + b2[0]
    h = jnp.dot(h, w3[0], preferred_element_type=jnp.float32) + b3[0]
    h = jnp.dot(h, w4[0], preferred_element_type=jnp.float32) + b4[0]
    out_ref[0] = jnp.dot(h, w5[0], preferred_element_type=jnp.float32) + b5[0]


def fused_hypernetwork_call(x, stacked_params):
    """Single gridded pallas_call over all hypernetworks.

    x:              (1, 32)
    stacked_params: [W1,b1,...,W5,b5] with a leading num_layers axis;
                    W5/b5 padded to n_pad (128-multiple) along the last dim.
    returns:        (num_layers, 1, n_pad) padded output slab.
    """
    num_layers = stacked_params[0].shape[0]
    n_pad = stacked_params[-1].shape[-1]

    def stacked_spec(r, c):
        return pl.BlockSpec((1, r, c), lambda j: (j, 0, 0))

    in_specs = [
        pl.BlockSpec((1, LATENT), lambda j: (0, 0)),            # x (shared)
        stacked_spec(LATENT, HIDDEN), stacked_spec(1, HIDDEN),  # W1, b1
        stacked_spec(HIDDEN, HIDDEN), stacked_spec(1, HIDDEN),  # W2, b2
        stacked_spec(HIDDEN, HIDDEN), stacked_spec(1, HIDDEN),  # W3, b3
        stacked_spec(HIDDEN, HIDDEN), stacked_spec(1, HIDDEN),  # W4, b4
        stacked_spec(HIDDEN, n_pad), stacked_spec(1, n_pad),    # W5, b5 (padded)
    ]

    flops = 2 * num_layers * (LATENT * HIDDEN + 3 * HIDDEN * HIDDEN + HIDDEN * n_pad)
    bytes_accessed = 4 * (x.size + sum(int(p.size) for p in stacked_params)
                          + num_layers * n_pad)

    return pl.pallas_call(
        fused_hyper_kernel,
        out_shape=jax.ShapeDtypeStruct((num_layers, 1, n_pad), jnp.float32),
        grid_spec=pltpu.PrefetchScalarGridSpec(
            num_scalar_prefetch=0,
            grid=(num_layers,),
            in_specs=in_specs,
            out_specs=pl.BlockSpec((1, 1, n_pad), lambda j: (j, 0, 0)),
        ),
        compiler_params=pltpu.CompilerParams(
            dimension_semantics=("parallel",)),   # megacore sharding on v7x
        cost_estimate=pl.CostEstimate(
            flops=flops, transcendentals=0, bytes_accessed=bytes_accessed),
    )(x, *stacked_params)


@functools.partial(jax.jit, static_argnames=("size_list", "output_size_list"))
def fullnetwork_forward(x, stacked_params, size_list, output_size_list):
    """Returns the list of generated weight matrices (the tensors the PyTorch
    forward binds onto modules[j].weight).
    # TODO(synk): returning a live nn.Sequential module object has no Pallas
    # equivalent; we return the generated weight matrices themselves.
    """
    out = fused_hypernetwork_call(x, stacked_params)   # (J, 1, n_pad)
    return [out[j, 0, :size_list[j]].reshape(output_size_list[j], -1)
            for j in range(len(size_list))]


# ----------------------------- parameter setup ------------------------------

def init_linear(key, fan_in, fan_out):
    """Deterministic PyTorch-default-style init; weight returned as (in, out)."""
    kw, kb = jax.random.split(key)
    bound = 1.0 / math.sqrt(fan_in)
    w_t = jax.random.uniform(kw, (fan_in, fan_out), jnp.float32, -bound, bound)
    b = jax.random.uniform(kb, (1, fan_out), jnp.float32, -bound, bound)
    return w_t, b


def build_fullnetwork_params(key, hidden_layer_dim, num_layers):
    size_list = [3 * hidden_layer_dim]
    output_size_list = [hidden_layer_dim]
    for _ in range(num_layers - 2):
        size_list.append(hidden_layer_dim * hidden_layer_dim)
        output_size_list.append(hidden_layer_dim)
    size_list.append(hidden_layer_dim * 32)
    output_size_list.append(32)

    hyper_params = []
    for j in range(num_layers):
        dims = [LATENT, HIDDEN, HIDDEN, HIDDEN, HIDDEN, size_list[j]]
        layers = []
        for li in range(5):
            key, sub = jax.random.split(key)
            layers.append(init_linear(sub, dims[li], dims[li + 1]))
        hyper_params.append(layers)
    return hyper_params, tuple(size_list), tuple(output_size_list)


def stack_hyper_params(hyper_params, n_pad):
    """Stack per-net params along a leading j axis; zero-pad W5/b5 to n_pad lanes."""
    stacked = []
    for li in range(5):
        ws, bs = [], []
        for layers in hyper_params:
            w, b = layers[li]
            if li == 4:
                w = jnp.pad(w, ((0, 0), (0, n_pad - w.shape[1])))
                b = jnp.pad(b, ((0, 0), (0, n_pad - b.shape[1])))
            ws.append(w)
            bs.append(b)
        stacked.append(jnp.stack(ws))
        stacked.append(jnp.stack(bs))
    return stacked


def reference_forward(x, hyper_params, output_size_list):
    """Pure-JAX reference of the PyTorch forward (layer-by-layer)."""
    outs = []
    for j, layers in enumerate(hyper_params):
        h = x
        for w, b in layers:
            h = h @ w + b
        outs.append(h.reshape(output_size_list[j], -1))
    return outs


if __name__ == "__main__":
    # Small config: latent dim is fixed at 32 by hypernetwork.layer1 = Linear(32, 256).
    hidden_layer_dim = 32
    num_layers = 4

    key = jax.random.PRNGKey(0)
    key_params, key_x = jax.random.split(key)

    hyper_params, size_list, output_size_list = build_fullnetwork_params(
        key_params, hidden_layer_dim, num_layers
    )
    x = jax.random.normal(key_x, (1, LATENT), jnp.float32)

    # Lane-dense padded output width (multiple of 128 covering the widest net).
    n_pad = ((max(size_list) + 127) // 128) * 128
    stacked_params = stack_hyper_params(hyper_params, n_pad)

    weights = fullnetwork_forward(x, stacked_params, size_list, output_size_list)
    weights = [jax.block_until_ready(w) for w in weights]

    # Shape checks: [H,3], [H,H], [H,H], [32,H]
    expected = [
        (hidden_layer_dim, 3),
        (hidden_layer_dim, hidden_layer_dim),
        (hidden_layer_dim, hidden_layer_dim),
        (32, hidden_layer_dim),
    ]
    refs = reference_forward(x, hyper_params, output_size_list)
    for w, exp, r in zip(weights, expected, refs):
        assert w.shape == exp, (w.shape, exp)
        assert bool(jnp.all(jnp.isfinite(w)))
        assert bool(jnp.allclose(w, r, rtol=5e-2, atol=1e-2)), \
            float(jnp.max(jnp.abs(w - r)))

    print("KERNEL_OK")
</pallas_src>

<mosaic_0001>
module attributes {stable_mosaic.version = 11 : i64} {
  func.func @fused_hyper_kernel(%arg0: i32, %arg1: memref<1x32xf32, #tpu.memory_space<vmem>>, %arg2: memref<1x32x256xf32, #tpu.memory_space<vmem>>, %arg3: memref<1x1x256xf32, #tpu.memory_space<vmem>>, %arg4: memref<1x256x256xf32, #tpu.memory_space<vmem>>, %arg5: memref<1x1x256xf32, #tpu.memory_space<vmem>>, %arg6: memref<1x256x256xf32, #tpu.memory_space<vmem>>, %arg7: memref<1x1x256xf32, #tpu.memory_space<vmem>>, %arg8: memref<1x256x256xf32, #tpu.memory_space<vmem>>, %arg9: memref<1x1x256xf32, #tpu.memory_space<vmem>>, %arg10: memref<1x256x1024xf32, #tpu.memory_space<vmem>>, %arg11: memref<1x1x1024xf32, #tpu.memory_space<vmem>>, %arg12: memref<1x1x1024xf32, #tpu.memory_space<vmem>>) attributes {dimension_semantics = [#tpu.dimension_semantics<parallel>], iteration_bounds = array<i64: 4>, scalar_prefetch = 0 : i64, scratch_operands = 0 : i64, tpu.core_type = #tpu.core_type<tc>, window_params = [{pipeline_mode = #tpu.pipeline_mode<synchronous>, transform_indices = @transform_0, window_bounds = array<i64: 1, 32>}, {transform_indices = @transform_1, window_bounds = array<i64: 1, 32, 256>}, {transform_indices = @transform_2, window_bounds = array<i64: 1, 1, 256>}, {transform_indices = @transform_3, window_bounds = array<i64: 1, 256, 256>}, {transform_indices = @transform_4, window_bounds = array<i64: 1, 1, 256>}, {transform_indices = @transform_5, window_bounds = array<i64: 1, 256, 256>}, {transform_indices = @transform_6, window_bounds = array<i64: 1, 1, 256>}, {transform_indices = @transform_7, window_bounds = array<i64: 1, 256, 256>}, {transform_indices = @transform_8, window_bounds = array<i64: 1, 1, 256>}, {transform_indices = @transform_9, window_bounds = array<i64: 1, 256, 1024>}, {transform_indices = @transform_10, window_bounds = array<i64: 1, 1, 1024>}, {transform_indices = @transform_11, window_bounds = array<i64: 1, 1, 1024>}]} {
    %c0 = arith.constant 0 : index
    %c0_0 = arith.constant 0 : index
    %0 = vector.load %arg1[%c0, %c0_0] : memref<1x32xf32, #tpu.memory_space<vmem>>, vector<1x32xf32>
    %c0_1 = arith.constant 0 : index
    %c0_2 = arith.constant 0 : index
    %c0_3 = arith.constant 0 : index
    %1 = vector.load %arg2[%c0_1, %c0_2, %c0_3] : memref<1x32x256xf32, #tpu.memory_space<vmem>>, vector<1x32x256xf32>
    %2 = vector.shape_cast %1 : vector<1x32x256xf32> to vector<32x256xf32>
    %cst = arith.constant dense<0.000000e+00> : vector<1x256xf32>
    %3 = tpu.matmul %0, %2, %cst {dimension_numbers = #tpu.dot_dimension_numbers<[1], [0], [0], [1], [0, 0, 1, 1], [], []>} : vector<1x32xf32>, vector<32x256xf32>, vector<1x256xf32> -> vector<1x256xf32>
    %c0_4 = arith.constant 0 : index
    %c0_5 = arith.constant 0 : index
    %c0_6 = arith.constant 0 : index
    %4 = vector.load %arg3[%c0_4, %c0_5, %c0_6] : memref<1x1x256xf32, #tpu.memory_space<vmem>>, vector<1x1x256xf32>
    %5 = vector.shape_cast %4 : vector<1x1x256xf32> to vector<1x256xf32>
    %6 = arith.addf %3, %5 : vector<1x256xf32>
    %c0_7 = arith.constant 0 : index
    %c0_8 = arith.constant 0 : index
    %c0_9 = arith.constant 0 : index
    %7 = vector.load %arg4[%c0_7, %c0_8, %c0_9] : memref<1x256x256xf32, #tpu.memory_space<vmem>>, vector<1x256x256xf32>
    %8 = vector.shape_cast %7 : vector<1x256x256xf32> to vector<256x256xf32>
    %cst_10 = arith.constant dense<0.000000e+00> : vector<1x256xf32>
    %9 = tpu.matmul %6, %8, %cst_10 {dimension_numbers = #tpu.dot_dimension_numbers<[1], [0], [0], [1], [0, 0, 1, 1], [], []>} : vector<1x256xf32>, vector<256x256xf32>, vector<1x256xf32> -> vector<1x256xf32>
    %c0_11 = arith.constant 0 : index
    %c0_12 = arith.constant 0 : index
    %c0_13 = arith.constant 0 : index
    %10 = vector.load %arg5[%c0_11, %c0_12, %c0_13] : memref<1x1x256xf32, #tpu.memory_space<vmem>>, vector<1x1x256xf32>
    %11 = vector.shape_cast %10 : vector<1x1x256xf32> to vector<1x256xf32>
    %12 = arith.addf %9, %11 : vector<1x256xf32>
    %c0_14 = arith.constant 0 : index
    %c0_15 = arith.constant 0 : index
    %c0_16 = arith.constant 0 : index
    %13 = vector.load %arg6[%c0_14, %c0_15, %c0_16] : memref<1x256x256xf32, #tpu.memory_space<vmem>>, vector<1x256x256xf32>
    %14 = vector.shape_cast %13 : vector<1x256x256xf32> to vector<256x256xf32>
    %cst_17 = arith.constant dense<0.000000e+00> : vector<1x256xf32>
    %15 = tpu.matmul %12, %14, %cst_17 {dimension_numbers = #tpu.dot_dimension_numbers<[1], [0], [0], [1], [0, 0, 1, 1], [], []>} : vector<1x256xf32>, vector<256x256xf32>, vector<1x256xf32> -> vector<1x256xf32>
    %c0_18 = arith.constant 0 : index
    %c0_19 = arith.constant 0 : index
    %c0_20 = arith.constant 0 : index
    %16 = vector.load %arg7[%c0_18, %c0_19, %c0_20] : memref<1x1x256xf32, #tpu.memory_space<vmem>>, vector<1x1x256xf32>
    %17 = vector.shape_cast %16 : vector<1x1x256xf32> to vector<1x256xf32>
    %18 = arith.addf %15, %17 : vector<1x256xf32>
    %c0_21 = arith.constant 0 : index
    %c0_22 = arith.constant 0 : index
    %c0_23 = arith.constant 0 : index
    %19 = vector.load %arg8[%c0_21, %c0_22, %c0_23] : memref<1x256x256xf32, #tpu.memory_space<vmem>>, vector<1x256x256xf32>
    %20 = vector.shape_cast %19 : vector<1x256x256xf32> to vector<256x256xf32>
    %cst_24 = arith.constant dense<0.000000e+00> : vector<1x256xf32>
    %21 = tpu.matmul %18, %20, %cst_24 {dimension_numbers = #tpu.dot_dimension_numbers<[1], [0], [0], [1], [0, 0, 1, 1], [], []>} : vector<1x256xf32>, vector<256x256xf32>, vector<1x256xf32> -> vector<1x256xf32>
    %c0_25 = arith.constant 0 : index
    %c0_26 = arith.constant 0 : index
    %c0_27 = arith.constant 0 : index
    %22 = vector.load %arg9[%c0_25, %c0_26, %c0_27] : memref<1x1x256xf32, #tpu.memory_space<vmem>>, vector<1x1x256xf32>
    %23 = vector.shape_cast %22 : vector<1x1x256xf32> to vector<1x256xf32>
    %24 = arith.addf %21, %23 : vector<1x256xf32>
    %c0_28 = arith.constant 0 : index
    %c0_29 = arith.constant 0 : index
    %c0_30 = arith.constant 0 : index
    %25 = vector.load %arg10[%c0_28, %c0_29, %c0_30] : memref<1x256x1024xf32, #tpu.memory_space<vmem>>, vector<1x256x1024xf32>
    %26 = vector.shape_cast %25 : vector<1x256x1024xf32> to vector<256x1024xf32>
    %cst_31 = arith.constant dense<0.000000e+00> : vector<1x1024xf32>
    %27 = tpu.matmul %24, %26, %cst_31 {dimension_numbers = #tpu.dot_dimension_numbers<[1], [0], [0], [1], [0, 0, 1, 1], [], []>} : vector<1x256xf32>, vector<256x1024xf32>, vector<1x1024xf32> -> vector<1x1024xf32>
    %c0_32 = arith.constant 0 : index
    %c0_33 = arith.constant 0 : index
    %c0_34 = arith.constant 0 : index
    %28 = vector.load %arg11[%c0_32, %c0_33, %c0_34] : memref<1x1x1024xf32, #tpu.memory_space<vmem>>, vector<1x1x1024xf32>
    %29 = vector.shape_cast %28 : vector<1x1x1024xf32> to vector<1x1024xf32>
    %30 = arith.addf %27, %29 : vector<1x1024xf32>
    %c0_35 = arith.constant 0 : index
    %c0_36 = arith.constant 0 : index
    %c0_37 = arith.constant 0 : index
    %31 = vector.load %arg12[%c0_35, %c0_36, %c0_37] : memref<1x1x1024xf32, #tpu.memory_space<vmem>>, vector<1x1x1024xf32>
    %32 = vector.shape_cast %31 : vector<1x1x1024xf32> to vector<1x1024xf32>
    %33 = vector.shape_cast %30 : vector<1x1024xf32> to vector<1x1x1024xf32>
    tpu.vector_store %arg12[%c0_35, %c0_36, %c0_37], %33 {strides = array<i32>} : memref<1x1x1024xf32, #tpu.memory_space<vmem>>, vector<1x1x1024xf32>,
    return
  }
  func.func @transform_0(%arg0: i32) -> (i32, i32) {
    %c0_i32 = arith.constant 0 : i32
    %c0_i32_0 = arith.constant 0 : i32
    %c0_i32_1 = arith.constant 0 : i32
    return %c0_i32, %c0_i32_0 : i32, i32
  }
  func.func @transform_1(%arg0: i32) -> (i32, i32, i32) {
    %c0_i32 = arith.constant 0 : i32
    %c0_i32_0 = arith.constant 0 : i32
    %c0_i32_1 = arith.constant 0 : i32
    return %arg0, %c0_i32, %c0_i32_0 : i32, i32, i32
  }
  func.func @transform_2(%arg0: i32) -> (i32, i32, i32) {
    %c0_i32 = arith.constant 0 : i32
    %c0_i32_0 = arith.constant 0 : i32
    %c0_i32_1 = arith.constant 0 : i32
    return %arg0, %c0_i32, %c0_i32_0 : i32, i32, i32
  }
  func.func @transform_3(%arg0: i32) -> (i32, i32, i32) {
    %c0_i32 = arith.constant 0 : i32
    %c0_i32_0 = arith.constant 0 : i32
    %c0_i32_1 = arith.constant 0 : i32
    return %arg0, %c0_i32, %c0_i32_0 : i32, i32, i32
  }
  func.func @transform_4(%arg0: i32) -> (i32, i32, i32) {
    %c0_i32 = arith.constant 0 : i32
    %c0_i32_0 = arith.constant 0 : i32
    %c0_i32_1 = arith.constant 0 : i32
    return %arg0, %c0_i32, %c0_i32_0 : i32, i32, i32
  }
  func.func @transform_5(%arg0: i32) -> (i32, i32, i32) {
    %c0_i32 = arith.constant 0 : i32
    %c0_i32_0 = arith.constant 0 : i32
    %c0_i32_1 = arith.constant 0 : i32
    return %arg0, %c0_i32, %c0_i32_0 : i32, i32, i32
  }
  func.func @transform_6(%arg0: i32) -> (i32, i32, i32) {
    %c0_i32 = arith.constant 0 : i32
    %c0_i32_0 = arith.constant 0 : i32
    %c0_i32_1 = arith.constant 0 : i32
    return %arg0, %c0_i32, %c0_i32_0 : i32, i32, i32
  }
  func.func @transform_7(%arg0: i32) -> (i32, i32, i32) {
    %c0_i32 = arith.constant 0 : i32
    %c0_i32_0 = arith.constant 0 : i32
    %c0_i32_1 = arith.constant 0 : i32
    return %arg0, %c0_i32, %c0_i32_0 : i32, i32, i32
  }
  func.func @transform_8(%arg0: i32) -> (i32, i32, i32) {
    %c0_i32 = arith.constant 0 : i32
    %c0_i32_0 = arith.constant 0 : i32
    %c0_i32_1 = arith.constant 0 : i32
    return %arg0, %c0_i32, %c0_i32_0 : i32, i32, i32
  }
  func.func @transform_9(%arg0: i32) -> (i32, i32, i32) {
    %c0_i32 = arith.constant 0 : i32
    %c0_i32_0 = arith.constant 0 : i32
    %c0_i32_1 = arith.constant 0 : i32
    return %arg0, %c0_i32, %c0_i32_0 : i32, i32, i32
  }
  func.func @transform_10(%arg0: i32) -> (i32, i32, i32) {
    %c0_i32 = arith.constant 0 : i32
    %c0_i32_0 = arith.constant 0 : i32
    %c0_i32_1 = arith.constant 0 : i32
    return %arg0, %c0_i32, %c0_i32_0 : i32, i32, i32
  }
  func.func @transform_11(%arg0: i32) -> (i32, i32, i32) {
    %c0_i32 = arith.constant 0 : i32
    %c0_i32_0 = arith.constant 0 : i32
    %c0_i32_1 = arith.constant 0 : i32
    return %arg0, %c0_i32, %c0_i32_0 : i32, i32, i32
  }
}

</mosaic_0001>

<bundles_post_ra>
// kernel: squeeze.7
= control target key start
LH: loop header
LB: loop body
LE: loop exit
PB: predicated region body
PF: predicated region fallthrough
CT: control target
= control target key end

     0   :  { %vm4_vm0 = vcmask 261120   ;;  %s95_s0 = inlined_call_operand.vmem [shape: f32[1024], index: 0, kind: input, shape index: {}]   ;;  %s96_s1 = inlined_call_operand.hbm [shape: f32[32,32], index: 1, kind: output, shape index: {}]  }
   0x1   :  { %v6_v0 = vld [vmem:[%s95_s0] sm:$0xff]  }
   0x2   :  { %2 = vsyncpa [#allocation1], 0  ;;  %s62_s0 = smov 96   ;;  %s63_s8 = smov 32   ;;  %5 = vst.msk [vmem:[#allocation0] ss:$4 sm:$0xff] %vm4_vm0, %v6_v0  }
   0x3   :  { %7 = vrot.lane.b32.xlu0 %v6_v0, %s62_s0  ;;  %19 = vrot.lane.b32.xlu1 %v6_v0, %s63_s8  ;;  %s64_s9 = smov 64   ;;  %s65_s10 = smov [#allocation0]  }
   0x4   :  { %s28_s11 = sshll.u32 %s65_s10, 4  ;;  %s29_s11 = int_to_ptr.vmem [resolvable:$true] %s28_s11 }
   0x5   :  { %s38_s12 = scalar_lea.vmem %s29_s11, 512  ;;  %p43_p1 = scmp.lt.s32.totalorder %s29_s11, %s29_s11 }
   0x6   :  { %p39_p0 = scmp.ne.s32.totalorder %s29_s11, %s38_s12  ;;  %p44_p2 = scmp.lt.s32.totalorder %s38_s12, %s38_s12 }
   0x7   :  { %13 = vrot.lane.b32.xlu0 %v6_v0, %s64_s9 }
   0x8   :  { %p45_p3 = por %p44_p2, %p43_p1 }
   0xa   :  { %p46_p4 = pnand %p45_p3, %p39_p0 }
  0x75   :  { %v8_v1 = vpop.permute.xlu0 %7   ;;  %v20_v2 = vpop.permute.xlu1 %19  }
  0x76   :  { %11 = vst.msk [vmem:[#allocation0 + $0x1] ss:$4 sm:$0xff] %vm4_vm0, %v8_v1   ;;  %23 = vst.msk [vmem:[#allocation0 + $0x3] ss:$4 sm:$0xff] %vm4_vm0, %v20_v2  }
  0x79   :  { %v14_v3 = vpop.permute.xlu0 %13  }
  0x7a   :  { %17 = vst.msk [vmem:[#allocation0 + $0x2] ss:$4 sm:$0xff] %vm4_vm0, %v14_v3  }
  0x7b   :  { %49 = shalt.err (!%p46_p4)
}
  0x7c   :  { %s50_s15 = scalar_lea.hbm %s96_s1, 512 }
  0x7d   :  { %p51_p5 = scmp.ne.s32.totalorder %s96_s1, %s50_s15  ;;  %p54_p6 = scmp.lt.u32.totalorder %s50_s15, %s96_s1 }
  0x7f   :  { %p56_p7 = pnand %p54_p6, %p51_p5 }
  0x81   :  { %59 = shalt.err (!%p56_p7)
}
  0x82   :  { %31 = dma.vmem_to_hbm [thread:$0]  %s29_s11, 512, %s96_s1, [#allocation1]  }
  0x83   :  { %60 = dma.done.wait [#allocation1], 512  }
  0x84   :  { %61 = vsyncadd [#allocation1], 4294966784 }
  0x85   :  { %33 = vsyncpa [#allocation1], 1 }

// kernel: squeeze.4
= control target key start
LH: loop header
LB: loop body
LE: loop exit
PB: predicated region body
PF: predicated region fallthrough
CT: control target
= control target key end

     0   :  { %s258_s8 = smov 119   ;;  %s259_s9 = smov 122   ;;  %vm7_vm0 = vcmask 23552   ;;  %s429_s0 = inlined_call_operand.vmem [shape: f32[96], index: 0, kind: input, shape index: {}]   ;;  %s430_s1 = inlined_call_operand.vmem [shape: f32[32,3], index: 1, kind: output, shape index: {}]  }
   0x1   :  { %v4_v0 = vld [vmem:[%s429_s0] sm:$0x1]  ;;  %s257_s0 = smov 125   ;;  %s260_s10 = smov 116  }
   0x2   :  { %5 = vst [vmem:[#allocation0] sm:$0x1] %v4_v0  ;;  %s261_s11 = smov 113   ;;  %s262_s12 = smov 110  }
   0x3   :  { %s263_s13 = smov 107   ;;  %s264_s14 = smov 104  }
   0x4   :  { %s265_s15 = smov 101   ;;  %s266_s16 = smov 98  }
   0x5   :  { %s267_s17 = smov 95   ;;  %s268_s18 = smov 92  }
   0x6   :  { %s269_s19 = smov 89   ;;  %s270_s20 = smov 86  }
   0x7   :  { %s271_s21 = smov 83   ;;  %s272_s22 = smov 80  }
   0x8   :  { %s273_s23 = smov 77   ;;  %s274_s24 = smov 74  }
   0x9   :  { %v9_v1 = vld [vmem:[#allocation0] sm:$0x1]   ;;  %s275_s25 = smov 71   ;;  %s276_s26 = smov 68  }
   0xa   :  { %v21_v2 = vld [vmem:[#allocation0] sm:$0x1]   ;;  %10 = vrot.lane.b32.xlu0 %v9_v1, %s257_s0  ;;  %s277_s27 = smov 65   ;;  %s278_s28 = smov 62  }
   0xb   :  { %22 = vrot.lane.b32.xlu1 %v21_v2, %s258_s8  ;;  %v15_v3 = vld [vmem:[#allocation0] sm:$0x1]   ;;  %s279_s29 = smov 59   ;;  %s280_s30 = smov 56  }
   0xc   :  { %v27_v4 = vld [vmem:[#allocation0] sm:$0x1]   ;;  %s281_s4 = smov 53   ;;  %s282_s5 = smov 50  }
   0xd   :  { %v33_v5 = vld [vmem:[#allocation0] sm:$0x1]   ;;  %s283_s6 = smov 47   ;;  %s284_s7 = smov 44  }
   0xe   :  { %16 = vrot.lane.b32.xlu0 %v15_v3, %s259_s9  ;;  %v39_v6 = vld [vmem:[#allocation0] sm:$0x1]   ;;  %s285_s0 = smov 41   ;;  %s286_s8 = smov 38  }
   0xf   :  { %28 = vrot.lane.b32.xlu1 %v27_v4, %s260_s10  ;;  %v45_v7 = vld [vmem:[#allocation0] sm:$0x1]   ;;  %s287_s9 = smov 35  }
  0x10   :  { %v51_v8 = vld [vmem:[#allocation0] sm:$0x1]  }
  0x11   :  { %v57_v9 = vld [vmem:[#allocation0] sm:$0x1]  }
  0x12   :  { %34 = vrot.lane.b32.xlu0 %v33_v5, %s261_s11  ;;  %v63_v10 = vld [vmem:[#allocation0] sm:$0x1]  }
  0x13   :  { %40 = vrot.lane.b32.xlu1 %v39_v6, %s262_s12  ;;  %v69_v11 = vld [vmem:[#allocation0] sm:$0x1]  }
  0x14   :  { %v75_v12 = vld [vmem:[#allocation0] sm:$0x1]  }
  0x15   :  { %v81_v13 = vld [vmem:[#allocation0] sm:$0x1]  }
  0x16   :  { %46 = vrot.lane.b32.xlu0 %v45_v7, %s263_s13  ;;  %v87_v14 = vld [vmem:[#allocation0] sm:$0x1]  }
  0x17   :  { %52 = vrot.lane.b32.xlu1 %v51_v8, %s264_s14  ;;  %v93_v15 = vld [vmem:[#allocation0] sm:$0x1]  }
  0x18   :  { %v99_v16 = vld [vmem:[#allocation0] sm:$0x1]  }
  0x19   :  { %v105_v17 = vld [vmem:[#allocation0] sm:$0x1]  }
  0x1a   :  { %58 = vrot.lane.b32.xlu0 %v57_v9, %s265_s15  ;;  %v111_v18 = vld [vmem:[#allocation0] sm:$0x1]  }
  0x1b   :  { %64 = vrot.lane.b32.xlu1 %v63_v10, %s266_s16  ;;  %v117_v19 = vld [vmem:[#allocation0] sm:$0x1]  }
  0x1c   :  { %v123_v20 = vld [vmem:[#allocation0] sm:$0x1]  }
  0x1d   :  { %v129_v21 = vld [vmem:[#allocation0] sm:$0x1]  }
  0x1e   :  { %70 = vrot.lane.b32.xlu0 %v69_v11, %s267_s17  ;;  %v135_v22 = vld [vmem:[#allocation0] sm:$0x1]  }
  0x1f   :  { %76 = vrot.lane.b32.xlu1 %v75_v12, %s268_s18  ;;  %v141_v23 = vld [vmem:[#allocation0] sm:$0x1]  }
  0x20   :  { %v147_v24 = vld [vmem:[#allocation0] sm:$0x1]  }
  0x21   :  { %v153_v25 = vld [vmem:[#allocation0] sm:$0x1]  }
  0x22   :  { %82 = vrot.lane.b32.xlu0 %v81_v13, %s269_s19  ;;  %v159_v26 = vld [vmem:[#allocation0] sm:$0x1]  }
  0x23   :  { %88 = vrot.lane.b32.xlu1 %v87_v14, %s270_s20  ;;  %v6_v27 = vld [vmem:[#allocation0] sm:$0x1]  }
  0x24   :  { %8 = vst.msk [vmem:[%s430_s1] sm:$0x1] %vm7_vm0, %v6_v27   ;;  %v165_v28 = vld [vmem:[#allocation0] sm:$0x1]  }
  0x25   :  { %v171_v29 = vld [vmem:[#allocation0] sm:$0x1]  }
  0x26   :  { %94 = vrot.lane.b32.xlu0 %v93_v15, %s271_s21  ;;  %v177_v30 = vld [vmem:[#allocation0] sm:$0x1]  }
  0x27   :  { %100 = vrot.lane.b32.xlu1 %v99_v16, %s272_s22  ;;  %v183_v31 = vld [vmem:[#allocation0] sm:$0x1]  }
  0x28   :  { %v189_v32 = vld [vmem:[#allocation0] sm:$0x1]  }
  0x2a   :  { %106 = vrot.lane.b32.xlu0 %v105_v17, %s273_s23 }
  0x2b   :  { %112 = vrot.lane.b32.xlu1 %v111_v18, %s274_s24 }
  0x2e   :  { %118 = vrot.lane.b32.xlu0 %v117_v19, %s275_s25 }
  0x2f   :  { %124 = vrot.lane.b32.xlu1 %v123_v20, %s276_s26 }
  0x32   :  { %130 = vrot.lane.b32.xlu0 %v129_v21, %s277_s27 }
  0x33   :  { %136 = vrot.lane.b32.xlu1 %v135_v22, %s278_s28 }
  0x36   :  { %142 = vrot.lane.b32.xlu0 %v141_v23, %s279_s29 }
  0x37   :  { %148 = vrot.lane.b32.xlu1 %v147_v24, %s280_s30 }
  0x3a   :  { %154 = vrot.lane.b32.xlu0 %v153_v25, %s281_s4 }
  0x3b   :  { %160 = vrot.lane.b32.xlu1 %v159_v26, %s282_s5 }
  0x3e   :  { %166 = vrot.lane.b32.xlu0 %v165_v28, %s283_s6 }
  0x3f   :  { %172 = vrot.lane.b32.xlu1 %v171_v29, %s284_s7 }
  0x42   :  { %178 = vrot.lane.b32.xlu0 %v177_v30, %s285_s0 }
  0x43   :  { %184 = vrot.lane.b32.xlu1 %v183_v31, %s286_s8 }
  0x46   :  { %190 = vrot.lane.b32.xlu0 %v189_v32, %s287_s9 }
  0x7c   :  { %v11_v33 = vpop.permute.xlu0 %10  }
  0x7d   :  { %v23_v34 = vpop.permute.xlu1 %22   ;;  %195 = vst.msk [vmem:[%s430_s1 + $0x1] sm:$0x1] %vm7_vm0, %v11_v33  }
  0x7e   :  { %197 = vst.msk [vmem:[%s430_s1 + $0x3] sm:$0x1] %vm7_vm0, %v23_v34  }
  0x80   :  { %v17_v35 = vpop.permute.xlu0 %16  }
  0x81   :  { %v29_v36 = vpop.permute.xlu1 %28   ;;  %196 = vst.msk [vmem:[%s430_s1 + $0x2] sm:$0x1] %vm7_vm0, %v17_v35  }
  0x82   :  { %198 = vst.msk [vmem:[%s430_s1 + $0x4] sm:$0x1] %vm7_vm0, %v29_v36  }
  0x84   :  { %v35_v37 = vpop.permute.xlu0 %34  }
  0x85   :  { %v41_v38 = vpop.permute.xlu1 %40   ;;  %199 = vst.msk [vmem:[%s430_s1 + $0x5] sm:$0x1] %vm7_vm0, %v35_v37  }
  0x86   :  { %200 = vst.msk [vmem:[%s430_s1 + $0x6] sm:$0x1] %vm7_vm0, %v41_v38  }
  0x88   :  { %v47_v39 = vpop.permute.xlu0 %46  }
  0x89   :  { %v53_v40 = vpop.permute.xlu1 %52   ;;  %201 = vst.msk [vmem:[%s430_s1 + $0x7] sm:$0x1] %vm7_vm0, %v47_v39  }
  0x8a   :  { %202 = vst.msk [vmem:[%s430_s1 + $0x8] sm:$0x1] %vm7_vm0, %v53_v40  }
  0x8c   :  { %v59_v41 = vpop.permute.xlu0 %58  }
  0x8d   :  { %v65_v42 = vpop.permute.xlu1 %64   ;;  %203 = vst.msk [vmem:[%s430_s1 + $0x9] sm:$0x1] %vm7_vm0, %v59_v41  }
  0x8e   :  { %204 = vst.msk [vmem:[%s430_s1 + $0xa] sm:$0x1] %vm7_vm0, %v65_v42  }
  0x90   :  { %v71_v43 = vpop.permute.xlu0 %70  }
  0x91   :  { %v77_v44 = vpop.permute.xlu1 %76   ;;  %205 = vst.msk [vmem:[%s430_s1 + $0xb] sm:$0x1] %vm7_vm0, %v71_v43  }
  0x92   :  { %206 = vst.msk [vmem:[%s430_s1 + $0xc] sm:$0x1] %vm7_vm0, %v77_v44  }
  0x94   :  { %v83_v45 = vpop.permute.xlu0 %82  }
  0x95   :  { %v89_v46 = vpop.permute.xlu1 %88   ;;  %207 = vst.msk [vmem:[%s430_s1 + $0xd] sm:$0x1] %vm7_vm0, %v83_v45  }
  0x96   :  { %208 = vst.msk [vmem:[%s430_s1 + $0xe] sm:$0x1] %vm7_vm0, %v89_v46  }
  0x98   :  { %v95_v47 = vpop.permute.xlu0 %94  }
  0x99   :  { %v101_v48 = vpop.permute.xlu1 %100   ;;  %209 = vst.msk [vmem:[%s430_s1 + $0xf] sm:$0x1] %vm7_vm0, %v95_v47  }
  0x9a   :  { %210 = vst.msk [vmem:[%s430_s1 + $0x10] sm:$0x1] %vm7_vm0, %v101_v48  }
  0x9c   :  { %v107_v49 = vpop.permute.xlu0 %106  }
  0x9d   :  { %v113_v50 = vpop.permute.xlu1 %112   ;;  %211 = vst.msk [vmem:[%s430_s1 + $0x11] sm:$0x1] %vm7_vm0, %v107_v49  }
  0x9e   :  { %212 = vst.msk [vmem:[%s430_s1 + $0x12] sm:$0x1] %vm7_vm0, %v113_v50  }
  0xa0   :  { %v119_v51 = vpop.permute.xlu0 %118  }
  0xa1   :  { %v125_v52 = vpop.permute.xlu1 %124   ;;  %213 = vst.msk [vmem:[%s430_s1 + $0x13] sm:$0x1] %vm7_vm0, %v119_v51  }
  0xa2   :  { %214 = vst.msk [vmem:[%s430_s1 + $0x14] sm:$0x1] %vm7_vm0, %v125_v52  }
  0xa4   :  { %v131_v53 = vpop.permute.xlu0 %130  }
  0xa5   :  { %v137_v54 = vpop.permute.xlu1 %136   ;;  %215 = vst.msk [vmem:[%s430_s1 + $0x15] sm:$0x1] %vm7_vm0, %v131_v53  }
  0xa6   :  { %216 = vst.msk [vmem:[%s430_s1 + $0x16] sm:$0x1] %vm7_vm0, %v137_v54  }
  0xa8   :  { %v143_v55 = vpop.permute.xlu0 %142  }
  0xa9   :  { %v149_v56 = vpop.permute.xlu1 %148   ;;  %217 = vst.msk [vmem:[%s430_s1 + $0x17] sm:$0x1] %vm7_vm0, %v143_v55  }
  0xaa   :  { %218 = vst.msk [vmem:[%s430_s1 + $0x18] sm:$0x1] %vm7_vm0, %v149_v56  }
  0xac   :  { %v155_v57 = vpop.permute.xlu0 %154  }
  0xad   :  { %v161_v58 = vpop.permute.xlu1 %160   ;;  %219 = vst.msk [vmem:[%s430_s1 + $0x19] sm:$0x1] %vm7_vm0, %v155_v57  }
  0xae   :  { %220 = vst.msk [vmem:[%s430_s1 + $0x1a] sm:$0x1] %vm7_vm0, %v161_v58  }
  0xb0   :  { %v167_v59 = vpop.permute.xlu0 %166  }
  0xb1   :  { %v173_v60 = vpop.permute.xlu1 %172   ;;  %221 = vst.msk [vmem:[%s430_s1 + $0x1b] sm:$0x1] %vm7_vm0, %v167_v59  }
  0xb2   :  { %222 = vst.msk [vmem:[%s430_s1 + $0x1c] sm:$0x1] %vm7_vm0, %v173_v60  }
  0xb4   :  { %v179_v61 = vpop.permute.xlu0 %178  }
  0xb5   :  { %v185_v62 = vpop.permute.xlu1 %184   ;;  %223 = vst.msk [vmem:[%s430_s1 + $0x1d] sm:$0x1] %vm7_vm0, %v179_v61  }
  0xb6   :  { %224 = vst.msk [vmem:[%s430_s1 + $0x1e] sm:$0x1] %vm7_vm0, %v185_v62  }
  0xb8   :  { %v191_v63 = vpop.permute.xlu0 %190  }
  0xb9   :  { %225 = vst.msk [vmem:[%s430_s1 + $0x1f] sm:$0x1] %vm7_vm0, %v191_v63  }

// kernel: fullnetwork_forward.1
= control target key start
LH: loop header
LB: loop body
LE: loop exit
PB: predicated region body
PF: predicated region fallthrough
CT: control target
= control target key end

     0   :  { %s4260_s0 = inlined_call_operand.hbm [shape: f32[1,32], index: 0, kind: input, shape index: {}]   ;;  %s4261_s1 = inlined_call_operand.hbm [shape: f32[4,32,256], index: 1, kind: input, shape index: {}]   ;;  %s4262_s2 = inlined_call_operand.hbm [shape: f32[4,1,256], index: 2, kind: input, shape index: {}]   ;;  %s4263_s3 = inlined_call_operand.hbm [shape: f32[4,256,256], index: 3, kind: input, shape index: {}]   ;;  %s4264_s4 = inlined_call_operand.hbm [shape: f32[4,1,256], index: 4, kind: input, shape index: {}]   ;;  %s4265_s5 = inlined_call_operand.hbm [shape: f32[4,256,256], index: 5, kind: input, shape index: {}]   ;;  %s4266_s6 = inlined_call_operand.hbm [shape: f32[4,1,256], index: 6, kind: input, shape index: {}]   ;;  %s4267_s7 = inlined_call_operand.hbm [shape: f32[4,256,256], index: 7, kind: input, shape index: {}]   ;;  %s4268_s8 = inlined_call_operand.hbm [shape: f32[4,1,256], index: 8, kind: input, shape index: {}]   ;;  %s4269_s9 = inlined_call_operand.hbm [shape: f32[4,256,1024], index: 9, kind: input, shape index: {}]   ;;  %s4270_s10 = inlined_call_operand.hbm [shape: f32[4,1,1024], index: 10, kind: input, shape index: {}]   ;;  %s4271_s11 = inlined_call_operand.vmem [shape: f32[4,1,1024], index: 11, kind: output, shape index: {}]  }
   0x1   :  { %4290 = sst [smem:[#allocation28_spill]] %s4260_s0 }
   0x2   :  { %4291 = sst [smem:[#allocation29_spill]] %s4261_s1 }
   0x3   :  { %4292 = sst [smem:[#allocation30_spill]] %s4263_s3 }
   0x4   :  { %4293 = sst [smem:[#allocation31_spill]] %s4265_s5 }
   0x5   :  { %4294 = sst [smem:[#allocation32_spill]] %s4267_s7 }
   0x6   :  { %4295 = sst [smem:[#allocation33_spill]] %s4269_s9 }
   0x7   :  { %4296 = sst [smem:[#allocation34_spill]] %s4271_s11 }
   0x8   :  { %16 = vsyncpa [#allocation3], 0 }
   0x9   :  { %17 = vsyncpa [#allocation5], 0 }
   0xa   :  { %19 = vsyncpa [#allocation5 + $0x1], 0 }
   0xb   :  { %20 = vsyncpa [#allocation8], 0 }
   0xc   :  { %22 = vsyncpa [#allocation8 + $0x1], 0 }
   0xd   :  { %23 = vsyncpa [#allocation11], 0 }
   0xe   :  { %25 = vsyncpa [#allocation11 + $0x1], 0 }
   0xf   :  { %26 = vsyncpa [#allocation14], 0 }
  0x10   :  { %28 = vsyncpa [#allocation14 + $0x1], 0 }
  0x11   :  { %29 = vsyncpa [#allocation17], 0 }
  0x12   :  { %31 = vsyncpa [#allocation17 + $0x1], 0  ;;  %s3278_s17 = smov 0   ;;  %s3280_s18 = smov 0  }
  0x13   :  { %s3282_s19 = smov 0   ;;  %s3284_s20 = smov 0  }
  0x14 LB: > { %4297 = sst [smem:[#allocation25_spill]] %s3195_s19  ;;  %s3299_s21 = sadd.s32 1, %s3199_s20   ;;  %s3199_s20 = sphi %s3284_s20, %s4330_s20   ;;  %s3195_s19 = sphi %s3282_s19, %s4332_s19   ;;  %s3191_s18 = sphi %s3280_s18, %s4334_s18   ;;  %s3187_s17 = sphi %s3278_s17, %s4333_s17  }
  0x15   : > { %4298 = sst [smem:[#allocation26_spill]] %s3299_s21  ;;  %s65_s22 = sadd.s32 1, %s3195_s19 }
  0x16   : > { %s62_s23 = ssub.s32 %s3199_s20, %s3299_s21  ;;  %p72_p0 = scmp.ne.s32.totalorder %s3195_s19, %s3191_s18 }
  0x17   : > { %p63_p1 = scmp.eq.s32.totalorder %s62_s23, 0  ;;  %p73_p2 = scmp.eq.s32.totalorder %s3199_s20, 0 }
  0x18   : > { %p2776_p3 = scmp.lt.s32.totalorder %s3199_s20, 4  ;;  %s3312_s25 = sand.u32 1, %s3199_s20  }
  0x19   : > { %s3309_s24 = scalar_select %p63_p1, %s3195_s19, %s65_s22  }
  0x1a   : > { %p74_p4 = por %p73_p2, %p72_p0  ;;  %s3315_s26 = sand.u32 1, %s3195_s19  }
  0x1b   : > { %4299 = sst [smem:[#allocation27_spill]] %s3309_s24  ;;  %s2204_s27 = sshll.u32 %s3315_s26, 6 }
  0x1c   : > { %s2250_s28 = sshll.u32 %s3199_s20, 10  ;;  %s4300_s1 = sld [smem:[#allocation29_spill]] }
  0x1d   : > { %s377_s13 = scalar_lea.vmem [#allocation4], %s2204_s27  ;;  %p3324_p5 = pnand %p2776_p3, %p74_p4 }
  0x1e   : > { %s384_s14 = sshll.u32 %s377_s13, 4  ;;  %s3328_s14 = int_to_ptr.vmem [resolvable:$true] %s384_s14 }
  0x1f   : > { %s4301_s15 = scalar_select %p3324_p5, 1, 0 }
  0x20   : > { %p3335_p7 = pneg %p3324_p5 }
  0x22   : > { %s3322_s12 = scalar_lea.hbm %s4300_s1, %s2250_s28  ;;  %s2822_s29 = scalar_lea.hbm %s4300_s1, 4096 }
  0x23   : > { %s2817_s22 = scalar_lea.hbm %s3322_s12, 1024  ;;  %p2823_p10 = scmp.lt.u32.totalorder %s3322_s12, %s4300_s1 }
  0x24   : > { %p2818_p6 = scmp.ne.s32.totalorder %s3322_s12, %s2817_s22  ;;  %p2824_p11 = scmp.lt.u32.totalorder %s2822_s29, %s2817_s22 }
  0x25   : > { %s4302_s23 = scalar_select %p3335_p7, 1, 0 }
  0x26   : > { %p2820_p8 = pnand %p3335_p7, %p2818_p6  ;;  %p2825_p12 = por %p2824_p11, %p2823_p10 }
  0x27   : > { %p2826_p13 = scmp.lt.u32.totalorder %s2817_s22, %s3322_s12 }
  0x28   : > { %p2821_p9 = pneg %p2820_p8 }
  0x29   : > { %p2827_p0 = por %p2826_p13, %p2825_p12 }
  0x2b   : > { %p2828_p1 = pnand %p2827_p0, %p2821_p9 }
  0x2d   : > { %2831 = shalt.err (!%p2828_p1)
}
  0x2e   : > { %s2832_s16 = scalar_lea.vmem %s3328_s14, 1024  ;;  %s3201_s27 = smov [#allocation4]  }
  0x2f   : > { %p2833_p2 = scmp.ne.s32.totalorder %s3328_s14, %s2832_s16  ;;  %s2837_s28 = sshll.u32 %s3201_s27, 4  ;;  %s2838_s28 = int_to_ptr.vmem [resolvable:$false] %s2837_s28 }
  0x30   : > { %s2839_s30 = scalar_lea.vmem %s2838_s28, 2048  ;;  %p2840_p6 = scmp.lt.s32.totalorder %s3328_s14, %s2838_s28 }
  0x31   : > { %p2835_p3 = pnand %p2833_p2, %p3335_p7  ;;  %p2841_p8 = scmp.lt.s32.totalorder %s2839_s30, %s2832_s16 }
  0x33   : > { %p2836_p4 = pneg %p2835_p3  ;;  %p2842_p10 = por %p2841_p8, %p2840_p6 }
  0x35   : > { %p2843_p11 = pnand %p2842_p10, %p2836_p4 }
  0x37   : > { %2846 = shalt.err (!%p2843_p11)
}
  0x38   : > { %s4273_s22 = smov 256   ;;  %s4275_s29 = smov 16  }
  0x39   : > { %s4303_s13 = scalar_lea.sflag [#allocation5], %s3312_s25  ;;  %s3364_s16 = sshll.u32 %s3315_s26, 9 }
  0x3a   : > { %2747 = dma.hbm_to_vmem [thread:$0]  (!%p3324_p5), %s3322_s12, 1024, %s3328_s14, %s4303_s13, %s4273_s22, %s4273_s22, %s4275_s29  }
  0x3b   : > { %s3367_s27 = sshll.u32 %s3199_s20, 13  ;;  %s4304_s3 = sld [smem:[#allocation30_spill]] }
  0x3c   : > { %s417_s24 = scalar_lea.vmem [#allocation7], %s3364_s16  ;;  %s4279_s12 = scalar_lea.sflag [#allocation8], %s3312_s25 }
  0x3d   : > { %s424_s19 = sshll.u32 %s417_s24, 4  ;;  %s3376_s19 = int_to_ptr.vmem [resolvable:$true] %s424_s19 }
  0x41   : > { %s3373_s1 = scalar_lea.hbm %s4304_s3, %s3367_s27  ;;  %s2852_s28 = scalar_lea.hbm %s4304_s3, 32768 }
  0x42   : > { %s2847_s14 = scalar_lea.hbm %s3373_s1, 8192  ;;  %p2853_p0 = scmp.lt.u32.totalorder %s3373_s1, %s4304_s3 }
  0x43   : > { %p2848_p9 = scmp.ne.s32.totalorder %s3373_s1, %s2847_s14  ;;  %p2854_p1 = scmp.lt.u32.totalorder %s2852_s28, %s2847_s14 }
  0x44   : > { %p2856_p3 = scmp.lt.u32.totalorder %s2847_s14, %s3373_s1 }
  0x45   : > { %p2850_p12 = pnand %p2848_p9, %p3335_p7  ;;  %p2855_p2 = por %p2854_p1, %p2853_p0 }
  0x47   : > { %p2851_p13 = pneg %p2850_p12  ;;  %p2857_p4 = por %p2856_p3, %p2855_p2 }
  0x49   : > { %p2858_p6 = pnand %p2857_p4, %p2851_p13 }
  0x4b   : > { %2861 = shalt.err (!%p2858_p6)
}
  0x4c   : > { %s2862_s24 = scalar_lea.vmem %s3376_s19, 8192  ;;  %s3204_s22 = smov [#allocation7]  }
  0x4d   : > { %p2863_p8 = scmp.ne.s32.totalorder %s3376_s19, %s2862_s24  ;;  %s2867_s13 = sshll.u32 %s3204_s22, 4  ;;  %s2868_s13 = int_to_ptr.vmem [resolvable:$false] %s2867_s13 }
  0x4e   : > { %s2869_s29 = scalar_lea.vmem %s2868_s13, 16384  ;;  %p2870_p9 = scmp.lt.s32.totalorder %s3376_s19, %s2868_s13 }
  0x4f   : > { %p2865_p10 = pnand %p2863_p8, %p3335_p7  ;;  %p2871_p12 = scmp.lt.s32.totalorder %s2869_s29, %s2862_s24 }
  0x51   : > { %p2866_p11 = pneg %p2865_p10  ;;  %p2872_p0 = por %p2871_p12, %p2870_p9 }
  0x53   : > { %p2873_p1 = pnand %p2872_p0, %p2866_p11 }
  0x55   : > { %2876 = shalt.err (!%p2873_p1)
}
  0x56   : > { %s4305_s14 = smov 16   ;;  %s4306_s28 = smov 256  }
  0x57   : > { %2753 = dma.hbm_to_vmem [thread:$0]  (!%p3324_p5), %s3373_s1, 8192, %s3376_s19, %s4279_s12, %s4306_s28, %s4306_s28, %s4305_s14  }
  0x58   : > { %s4307_s5 = sld [smem:[#allocation31_spill]]  ;;  %s457_s13 = scalar_lea.vmem [#allocation10], %s3364_s16 }
  0x59   : > { %s464_s29 = sshll.u32 %s457_s13, 4  ;;  %s4280_s3 = scalar_lea.sflag [#allocation11], %s3312_s25  ;;  %s3412_s29 = int_to_ptr.vmem [resolvable:$true] %s464_s29 }
  0x5e   : > { %s3409_s24 = scalar_lea.hbm %s4307_s5, %s3367_s27  ;;  %s2882_s30 = scalar_lea.hbm %s4307_s5, 32768 }
  0x5f   : > { %s2877_s21 = scalar_lea.hbm %s3409_s24, 8192  ;;  %p2883_p4 = scmp.lt.u32.totalorder %s3409_s24, %s4307_s5 }
  0x60   : > { %p2878_p13 = scmp.ne.s32.totalorder %s3409_s24, %s2877_s21  ;;  %p2884_p6 = scmp.lt.u32.totalorder %s2882_s30, %s2877_s21 }
  0x61   : > { %p2886_p10 = scmp.lt.u32.totalorder %s2877_s21, %s3409_s24 }
  0x62   : > { %p2880_p2 = pnand %p2878_p13, %p3335_p7  ;;  %p2885_p8 = por %p2884_p6, %p2883_p4 }
  0x64   : > { %p2881_p3 = pneg %p2880_p2  ;;  %p2887_p11 = por %p2886_p10, %p2885_p8 }
  0x66   : > { %p2888_p9 = pnand %p2887_p11, %p2881_p3 }
  0x68   : > { %2891 = shalt.err (!%p2888_p9)
}
  0x69   : > { %s2892_s13 = scalar_lea.vmem %s3412_s29, 8192  ;;  %s3205_s1 = smov [#allocation10]  }
  0x6a   : > { %p2893_p12 = scmp.ne.s32.totalorder %s3412_s29, %s2892_s13  ;;  %s2897_s19 = sshll.u32 %s3205_s1, 4  ;;  %s2898_s19 = int_to_ptr.vmem [resolvable:$false] %s2897_s19 }
  0x6b   : > { %s2899_s12 = scalar_lea.vmem %s2898_s19, 16384  ;;  %p2900_p13 = scmp.lt.s32.totalorder %s3412_s29, %s2898_s19 }
  0x6c   : > { %p2895_p0 = pnand %p2893_p12, %p3335_p7  ;;  %p2901_p2 = scmp.lt.s32.totalorder %s2899_s12, %s2892_s13 }
  0x6e   : > { %p2896_p1 = pneg %p2895_p0  ;;  %p2902_p4 = por %p2901_p2, %p2900_p13 }
  0x70   : > { %p2903_p6 = pnand %p2902_p4, %p2896_p1 }
  0x72   : > { %2906 = shalt.err (!%p2903_p6)
}
  0x73   : > { %2759 = dma.hbm_to_vmem [thread:$0]  (!%p3324_p5), %s3409_s24, 8192, %s3412_s29, %s4280_s3, %s4306_s28, %s4306_s28, %s4305_s14  }
  0x74   : > { %s4308_s7 = sld [smem:[#allocation32_spill]]  ;;  %s497_s13 = scalar_lea.vmem [#allocation13], %s3364_s16 }
  0x75   : > { %s504_s1 = sshll.u32 %s497_s13, 4  ;;  %s4282_s19 = scalar_lea.sflag [#allocation14], %s3312_s25  ;;  %s3448_s1 = int_to_ptr.vmem [resolvable:$true] %s504_s1 }
  0x7a   : > { %s3445_s22 = scalar_lea.hbm %s4308_s7, %s3367_s27  ;;  %s2912_s21 = scalar_lea.hbm %s4308_s7, 32768 }
  0x7b   : > { %s2907_s12 = scalar_lea.hbm %s3445_s22, 8192  ;;  %p2913_p11 = scmp.lt.u32.totalorder %s3445_s22, %s4308_s7 }
  0x7c   : > { %p2908_p3 = scmp.ne.s32.totalorder %s3445_s22, %s2907_s12  ;;  %p2914_p9 = scmp.lt.u32.totalorder %s2912_s21, %s2907_s12 }
  0x7d   : > { %p2916_p0 = scmp.lt.u32.totalorder %s2907_s12, %s3445_s22 }
  0x7e   : > { %p2910_p8 = pnand %p2908_p3, %p3335_p7  ;;  %p2915_p12 = por %p2914_p9, %p2913_p11 }
  0x80   : > { %p2911_p10 = pneg %p2910_p8  ;;  %p2917_p1 = por %p2916_p0, %p2915_p12 }
  0x82   : > { %p2918_p13 = pnand %p2917_p1, %p2911_p10 }
  0x84   : > { %2921 = shalt.err (!%p2918_p13)
}
  0x85   : > { %s2922_s16 = scalar_lea.vmem %s3448_s1, 8192  ;;  %s3206_s13 = smov [#allocation13]  }
  0x86   : > { %p2923_p2 = scmp.ne.s32.totalorder %s3448_s1, %s2922_s16  ;;  %s2927_s24 = sshll.u32 %s3206_s13, 4  ;;  %s2928_s24 = int_to_ptr.vmem [resolvable:$false] %s2927_s24 }
  0x87   : > { %s2929_s29 = scalar_lea.vmem %s2928_s24, 16384  ;;  %p2930_p3 = scmp.lt.s32.totalorder %s3448_s1, %s2928_s24 }
  0x88   : > { %p2925_p4 = pnand %p2923_p2, %p3335_p7  ;;  %p2931_p8 = scmp.lt.s32.totalorder %s2929_s29, %s2922_s16 }
  0x8a   : > { %p2926_p6 = pneg %p2925_p4  ;;  %p2932_p11 = por %p2931_p8, %p2930_p3 }
  0x8c   : > { %p2933_p9 = pnand %p2932_p11, %p2926_p6 }
  0x8e   : > { %2936 = shalt.err (!%p2933_p9)
}
  0x8f   : > { %2765 = dma.hbm_to_vmem [thread:$0]  (!%p3324_p5), %s3445_s22, 8192, %s3448_s1, %s4282_s19, %s4306_s28, %s4306_s28, %s4305_s14  }
  0x90   : > { %s2228_s12 = sshll.u32 %s3315_s26, 11  ;;  %s2258_s21 = sshll.u32 %s3199_s20, 15 }
  0x91   : > { %s4309_s9 = sld [smem:[#allocation33_spill]]  ;;  %s537_s13 = scalar_lea.vmem [#allocation16], %s2228_s12 }
  0x92   : > { %s544_s24 = sshll.u32 %s537_s13, 4  ;;  %s4281_s29 = scalar_lea.sflag [#allocation17], %s3312_s25  ;;  %s3484_s24 = int_to_ptr.vmem [resolvable:$true] %s544_s24 }
  0x97   : > { %s3482_s16 = scalar_lea.hbm %s4309_s9, %s2258_s21  ;;  %s2942_s22 = scalar_lea.hbm %s4309_s9, 131072 }
  0x98   : > { %s2937_s3 = scalar_lea.hbm %s3482_s16, 32768  ;;  %p2943_p1 = scmp.lt.u32.totalorder %s3482_s16, %s4309_s9 }
  0x99   : > { %p2938_p10 = scmp.ne.s32.totalorder %s3482_s16, %s2937_s3  ;;  %p2944_p13 = scmp.lt.u32.totalorder %s2942_s22, %s2937_s3 }
  0x9a   : > { %p2946_p4 = scmp.lt.u32.totalorder %s2937_s3, %s3482_s16 }
  0x9b   : > { %p2940_p12 = pnand %p2938_p10, %p3335_p7  ;;  %p2945_p2 = por %p2944_p13, %p2943_p1 }
  0x9d   : > { %p2941_p0 = pneg %p2940_p12  ;;  %p2947_p6 = por %p2946_p4, %p2945_p2 }
  0x9f   : > { %p2948_p3 = pnand %p2947_p6, %p2941_p0 }
  0xa1   : > { %2951 = shalt.err (!%p2948_p3)
}
  0xa2   : > { %s2952_s12 = scalar_lea.vmem %s3484_s24, 32768  ;;  %s3207_s27 = smov [#allocation16]  }
  0xa3   : > { %p2953_p8 = scmp.ne.s32.totalorder %s3484_s24, %s2952_s12  ;;  %s2957_s30 = sshll.u32 %s3207_s27, 4  ;;  %s2958_s30 = int_to_ptr.vmem [resolvable:$false] %s2957_s30 }
  0xa4   : > { %s2959_s13 = scalar_lea.vmem %s2958_s30, 65536  ;;  %p2960_p10 = scmp.lt.s32.totalorder %s3484_s24, %s2958_s30 }
  0xa5   : > { %p2955_p11 = pnand %p2953_p8, %p3335_p7  ;;  %p2961_p12 = scmp.lt.s32.totalorder %s2959_s13, %s2952_s12 }
  0xa7   : > { %p2956_p9 = pneg %p2955_p11  ;;  %p2962_p1 = por %p2961_p12, %p2960_p10 }
  0xa9   : > { %p2963_p13 = pnand %p2962_p1, %p2956_p9 }
  0xab   : > { %2966 = shalt.err (!%p2963_p13)
}
  0xac   : > { %s3208_s3 = smov 1024   ;;  %s3209_s14 = smov 64  }
  0xad   : > { %2771 = dma.hbm_to_vmem [thread:$0]  (!%p3324_p5), %s3482_s16, 32768, %s3484_s24, %s4281_s29, %s3208_s3, %s3208_s3, %s3209_s14  }
  0xae   : > { %s3511_s28 = sadd.s32 4294967295, %s3199_s20   ;;  %p78_p2 = scmp.ne.s32.totalorder %s3191_s18, %s3187_s17 }
  0xaf   : > { %p4283_p0 = scmp.eq.s32.totalorder %s3511_s28, 0  ;;  %p2201_p4 = scmp.ge.s32.totalorder %s3199_s20, 1 }
  0xb0   : > { %p349_p6 = scmp.lt.s32.totalorder %s3199_s20, 5  ;;  %s3210_s16 = smov [#allocation2]  }
  0xb1   : > { %p3520_p3 = por %p4283_p0, %p78_p2  ;;  %s362_s24 = sshll.u32 %s3210_s16, 4  ;;  %s363_s24 = int_to_ptr.vmem [resolvable:$true] %s362_s24 }
  0xb2   : > { %p3524_p8 = pnand %p2201_p4, %p349_p6  ;;  %s3529_s21 = sshll.u32 %s3315_s26, 1 }
  0xb3   : > { %s4310_s22 = scalar_select %p3520_p3, 1, 0 }
  0xb4   : > { %s4311_s1 = scalar_select %p3524_p8, 1, 0 }
  0xb5   : > { %p2740_p11 = pneg %p3524_p8  ;;  %s3534_s17 = sshll.u32 %s3199_s20, 5 }
  0xb6   : > { %s398_s12 = scalar_lea.vmem [#allocation6], %s3529_s21  ;;  %s3547_s14 = scalar_lea.hbm %s4262_s2, %s3534_s17 }
  0xb7   : > { %s406_s27 = sshll.u32 %s398_s12, 4  ;;  %p3539_p9 = pnand %p2740_p11, %p4283_p0  ;;  %s3549_s27 = int_to_ptr.vmem [resolvable:$true] %s406_s27 }
  0xb8   : > { %s3555_s19 = scalar_lea.hbm %s4264_s4, %s3534_s17  ;;  %s4313_s0 = sld [smem:[#allocation28_spill]] }
  0xb9   : > { %p2969_p12 = pneg %p3539_p9 }
  0xbe   : > { %s2967_s7 = scalar_lea.hbm %s4313_s0, 16 }
  0xbf   : > { %p2968_p10 = scmp.ne.s32.totalorder %s4313_s0, %s2967_s7  ;;  %p2974_p2 = scmp.lt.u32.totalorder %s2967_s7, %s4313_s0 }
  0xc1   : > { %p2970_p1 = pnand %p2969_p12, %p2968_p10 }
  0xc3   : > { %p2971_p13 = pneg %p2970_p1 }
  0xc5   : > { %p2976_p4 = pnand %p2974_p2, %p2971_p13 }
  0xc7   : > { %2979 = shalt.err (!%p2976_p4)
}
  0xc8   : > { %s2980_s29 = scalar_lea.vmem %s363_s24, 16  ;;  %s2987_s5 = scalar_lea.vmem %s363_s24, 32 }
  0xc9   : > { %p2981_p6 = scmp.ne.s32.totalorder %s363_s24, %s2980_s29  ;;  %p2988_p3 = scmp.lt.s32.totalorder %s363_s24, %s363_s24 }
  0xca   : > { %p2989_p8 = scmp.lt.s32.totalorder %s2987_s5, %s2980_s29 }
  0xcb   : > { %p2983_p11 = pnand %p2981_p6, %p2969_p12 }
  0xcc   : > { %p2990_p5 = por %p2989_p8, %p2988_p3 }
  0xcd   : > { %p2984_p0 = pneg %p2983_p11 }
  0xcf   : > { %p2991_p7 = pnand %p2990_p5, %p2984_p0 }
  0xd1   : > { %2994 = shalt.err (!%p2991_p7)
}
  0xd2   : > { %2743 = dma.hbm_to_vmem [thread:$0]  (!%p3539_p9), %s4313_s0, 16, %s363_s24, [#allocation3]  }
  0xd3   : > { %s2995_s7 = scalar_lea.hbm %s3547_s14, 32  ;;  %p4314_p12 = scmp.ne.s32.totalorder %s4302_s23, 0 }
  0xd4   : > { %p2996_p10 = scmp.ne.s32.totalorder %s3547_s14, %s2995_s7  ;;  %s3000_s13 = scalar_lea.hbm %s4262_s2, 128 }
  0xd5   : > { %p3001_p5 = scmp.lt.u32.totalorder %s3547_s14, %s4262_s2  ;;  %p3002_p7 = scmp.lt.u32.totalorder %s3000_s13, %s2995_s7 }
  0xd6   : > { %p2998_p1 = pnand %p2996_p10, %p4314_p12  ;;  %p3004_p3 = scmp.lt.u32.totalorder %s2995_s7, %s3547_s14 }
  0xd7   : > { %p3003_p0 = por %p3002_p7, %p3001_p5 }
  0xd8   : > { %p2999_p13 = pneg %p2998_p1 }
  0xd9   : > { %p3005_p8 = por %p3004_p3, %p3003_p0 }
  0xdb   : > { %p3006_p2 = pnand %p3005_p8, %p2999_p13 }
  0xdd   : > { %3009 = shalt.err (!%p3006_p2)
}
  0xde   : > { %s3010_s24 = scalar_lea.vmem %s3549_s27, 32  ;;  %s3211_s29 = smov [#allocation6]  }
  0xdf   : > { %p3011_p9 = scmp.ne.s32.totalorder %s3549_s27, %s3010_s24  ;;  %s3015_s5 = sshll.u32 %s3211_s29, 4  ;;  %s3016_s5 = int_to_ptr.vmem [resolvable:$false] %s3015_s5 }
  0xe0   : > { %s3017_s9 = scalar_lea.vmem %s3016_s5, 64  ;;  %p3018_p11 = scmp.lt.s32.totalorder %s3549_s27, %s3016_s5 }
  0xe1   : > { %p3013_p4 = pnand %p3011_p9, %p4314_p12  ;;  %p3019_p10 = scmp.lt.s32.totalorder %s3017_s9, %s3010_s24 }
  0xe3   : > { %p3014_p6 = pneg %p3013_p4  ;;  %p3020_p1 = por %p3019_p10, %p3018_p11 }
  0xe5   : > { %p3021_p5 = pnand %p3020_p1, %p3014_p6 }
  0xe7   : > { %3024 = shalt.err (!%p3021_p5)
}
  0xe8   : > { %p4315_p13 = scmp.ne.s32.totalorder %s4301_s15, 0  ;;  %s4316_s11 = scalar_lea.sflag [#allocation5], %s3312_s25 }
  0xe9   : > { %s438_s7 = scalar_lea.vmem [#allocation9], %s3529_s21  ;;  %s3601_s3 = scalar_lea.hbm %s4266_s6, %s3534_s17 }
  0xea   : > { %2750 = dma.hbm_to_vmem [thread:$0]  (!%p4315_p13), %s3547_s14, 32, %s3549_s27, %s4316_s11  }
  0xeb   : > { %s446_s16 = sshll.u32 %s438_s7, 4  ;;  %s3025_s30 = scalar_lea.hbm %s3555_s19, 32  ;;  %s447_s16 = int_to_ptr.vmem [resolvable:$true] %s446_s16 }
  0xec   : > { %p3026_p7 = scmp.ne.s32.totalorder %s3555_s19, %s3025_s30  ;;  %s3030_s5 = scalar_lea.hbm %s4264_s4, 128 }
  0xed   : > { %p3031_p8 = scmp.lt.u32.totalorder %s3555_s19, %s4264_s4  ;;  %p3032_p2 = scmp.lt.u32.totalorder %s3030_s5, %s3025_s30 }
  0xee   : > { %p3028_p0 = pnand %p3026_p7, %p4314_p12  ;;  %p3034_p4 = scmp.lt.u32.totalorder %s3025_s30, %s3555_s19 }
  0xef   : > { %p3033_p9 = por %p3032_p2, %p3031_p8 }
  0xf0   : > { %p3029_p3 = pneg %p3028_p0 }
  0xf1   : > { %p3035_p6 = por %p3034_p4, %p3033_p9 }
  0xf3   : > { %p3036_p11 = pnand %p3035_p6, %p3029_p3 }
  0xf5   : > { %3039 = shalt.err (!%p3036_p11)
}
  0xf6   : > { %s3040_s27 = scalar_lea.vmem %s447_s16, 32  ;;  %s3212_s14 = smov [#allocation9]  }
  0xf7   : > { %p3041_p10 = scmp.ne.s32.totalorder %s447_s16, %s3040_s27  ;;  %s3045_s11 = sshll.u32 %s3212_s14, 4  ;;  %s3046_s11 = int_to_ptr.vmem [resolvable:$false] %s3045_s11 }
  0xf8   : > { %s3047_s7 = scalar_lea.vmem %s3046_s11, 64  ;;  %p3048_p7 = scmp.lt.s32.totalorder %s447_s16, %s3046_s11 }
  0xf9   : > { %p3043_p1 = pnand %p3041_p10, %p4314_p12  ;;  %p3049_p0 = scmp.lt.s32.totalorder %s3047_s7, %s3040_s27 }
  0xfb   : > { %p3044_p5 = pneg %p3043_p1  ;;  %p3050_p13 = por %p3049_p0, %p3048_p7 }
  0xfd   : > { %p3051_p2 = pnand %p3050_p13, %p3044_p5 }
  0xff   : > { %3054 = shalt.err (!%p3051_p2)
}
 0x100   : > { %p4317_p8 = scmp.ne.s32.totalorder %s4301_s15, 0  ;;  %s4318_s0 = scalar_lea.sflag [#allocation8], %s3312_s25 }
 0x101   : > { %s478_s12 = scalar_lea.vmem [#allocation12], %s3529_s21  ;;  %s3627_s29 = scalar_lea.hbm %s4268_s8, %s3534_s17 }
 0x102   : > { %2756 = dma.hbm_to_vmem [thread:$0]  (!%p4317_p8), %s3555_s19, 32, %s447_s16, %s4318_s0  }
 0x103   : > { %s486_s13 = sshll.u32 %s478_s12, 4  ;;  %s3055_s5 = scalar_lea.hbm %s3601_s3, 32  ;;  %s487_s13 = int_to_ptr.vmem [resolvable:$true] %s486_s13 }
 0x104   : > { %p3056_p13 = scmp.ne.s32.totalorder %s3601_s3, %s3055_s5  ;;  %s3060_s14 = scalar_lea.hbm %s4266_s6, 128 }
 0x105   : > { %p3061_p4 = scmp.lt.u32.totalorder %s3601_s3, %s4266_s6  ;;  %p3062_p6 = scmp.lt.u32.totalorder %s3060_s14, %s3055_s5 }
 0x106   : > { %p3058_p3 = pnand %p3056_p13, %p4314_p12  ;;  %p3064_p10 = scmp.lt.u32.totalorder %s3055_s5, %s3601_s3 }
 0x107   : > { %p3063_p11 = por %p3062_p6, %p3061_p4 }
 0x108   : > { %p3059_p9 = pneg %p3058_p3 }
 0x109   : > { %p3065_p1 = por %p3064_p10, %p3063_p11 }
 0x10b   : > { %p3066_p5 = pnand %p3065_p1, %p3059_p9 }
 0x10d   : > { %3069 = shalt.err (!%p3066_p5)
}
 0x10e   : > { %s3070_s19 = scalar_lea.vmem %s487_s13, 32  ;;  %s3213_s17 = smov [#allocation12]  }
 0x10f   : > { %p3071_p7 = scmp.ne.s32.totalorder %s487_s13, %s3070_s19  ;;  %s3075_s16 = sshll.u32 %s3213_s17, 4  ;;  %s3076_s16 = int_to_ptr.vmem [resolvable:$false] %s3075_s16 }
 0x110   : > { %s3077_s0 = scalar_lea.vmem %s3076_s16, 64  ;;  %p3078_p13 = scmp.lt.s32.totalorder %s487_s13, %s3076_s16 }
 0x111   : > { %p3073_p0 = pnand %p3071_p7, %p4314_p12  ;;  %p3079_p3 = scmp.lt.s32.totalorder %s3077_s0, %s3070_s19 }
 0x113   : > { %p3074_p2 = pneg %p3073_p0  ;;  %p3080_p8 = por %p3079_p3, %p3078_p13 }
 0x115   : > { %p3081_p4 = pnand %p3080_p8, %p3074_p2 }
 0x117   : > { %3084 = shalt.err (!%p3081_p4)
}
 0x118   : > { %p4319_p6 = scmp.ne.s32.totalorder %s4301_s15, 0  ;;  %s4320_s12 = scalar_lea.sflag [#allocation11], %s3312_s25 }
 0x119   : > { %s518_s30 = scalar_lea.vmem [#allocation15], %s3529_s21  ;;  %s2231_s5 = sshll.u32 %s3315_s26, 3 }
 0x11a   : > { %2762 = dma.hbm_to_vmem [thread:$0]  (!%p4319_p6), %s3601_s3, 32, %s487_s13, %s4320_s12  }
 0x11b   : > { %s526_s24 = sshll.u32 %s518_s30, 4  ;;  %s3085_s9 = scalar_lea.hbm %s3627_s29, 32  ;;  %s527_s24 = int_to_ptr.vmem [resolvable:$true] %s526_s24 }
 0x11c   : > { %p3086_p8 = scmp.ne.s32.totalorder %s3627_s29, %s3085_s9  ;;  %s3090_s11 = scalar_lea.hbm %s4268_s8, 128 }
 0x11d   : > { %p3091_p10 = scmp.lt.u32.totalorder %s3627_s29, %s4268_s8  ;;  %p3092_p1 = scmp.lt.u32.totalorder %s3090_s11, %s3085_s9 }
 0x11e   : > { %p3088_p9 = pnand %p3086_p8, %p4314_p12  ;;  %p3094_p7 = scmp.lt.u32.totalorder %s3085_s9, %s3627_s29 }
 0x11f   : > { %p3093_p5 = por %p3092_p1, %p3091_p10 }
 0x120   : > { %p3089_p11 = pneg %p3088_p9 }
 0x121   : > { %p3095_p0 = por %p3094_p7, %p3093_p5 }
 0x123   : > { %p3096_p2 = pnand %p3095_p0, %p3089_p11 }
 0x125   : > { %3099 = shalt.err (!%p3096_p2)
}
 0x126   : > { %s3100_s21 = scalar_lea.vmem %s527_s24, 32  ;;  %s3214_s3 = smov [#allocation15]  }
 0x127   : > { %p3101_p13 = scmp.ne.s32.totalorder %s527_s24, %s3100_s21  ;;  %s3105_s13 = sshll.u32 %s3214_s3, 4  ;;  %s3106_s13 = int_to_ptr.vmem [resolvable:$false] %s3105_s13 }
 0x128   : > { %s3107_s17 = scalar_lea.vmem %s3106_s13, 64  ;;  %p3108_p8 = scmp.lt.s32.totalorder %s527_s24, %s3106_s13 }
 0x129   : > { %p3103_p3 = pnand %p3101_p13, %p4314_p12  ;;  %p3109_p9 = scmp.lt.s32.totalorder %s3107_s17, %s3100_s21 }
 0x12b   : > { %p3104_p4 = pneg %p3103_p3  ;;  %p3110_p6 = por %p3109_p9, %p3108_p8 }
 0x12d   : > { %p3111_p1 = pnand %p3110_p6, %p3104_p4 }
 0x12f   : > { %3114 = shalt.err (!%p3111_p1)
}
 0x130   : > { %p4321_p10 = scmp.ne.s32.totalorder %s4301_s15, 0  ;;  %s4322_s16 = scalar_lea.sflag [#allocation14], %s3312_s25 }
 0x131   : > { %s2259_s0 = sshll.u32 %s3199_s20, 7  ;;  %s558_s12 = scalar_lea.vmem [#allocation18], %s2231_s5 }
 0x132   : > { %2768 = dma.hbm_to_vmem [thread:$0]  (!%p4321_p10), %s3627_s29, 32, %s527_s24, %s4322_s16  }
 0x133   : > { %s566_s30 = sshll.u32 %s558_s12, 4  ;;  %s564_s14 = scalar_lea.hbm %s4270_s10, %s2259_s0  ;;  %s567_s30 = int_to_ptr.vmem [resolvable:$true] %s566_s30 }
 0x134   : > { %s3115_s11 = scalar_lea.hbm %s564_s14, 128  ;;  %s3120_s21 = scalar_lea.hbm %s4270_s10, 512 }
 0x135   : > { %p3116_p6 = scmp.ne.s32.totalorder %s564_s14, %s3115_s11  ;;  %p3121_p7 = scmp.lt.u32.totalorder %s564_s14, %s4270_s10 }
 0x136   : > { %p3122_p0 = scmp.lt.u32.totalorder %s3120_s21, %s3115_s11  ;;  %p3124_p13 = scmp.lt.u32.totalorder %s3115_s11, %s564_s14 }
 0x137   : > { %p3118_p11 = pnand %p3116_p6, %p4314_p12 }
 0x138   : > { %p3123_p2 = por %p3122_p0, %p3121_p7 }
 0x139   : > { %p3119_p5 = pneg %p3118_p11 }
 0x13a   : > { %p3125_p3 = por %p3124_p13, %p3123_p2 }
 0x13c   : > { %p3126_p4 = pnand %p3125_p3, %p3119_p5 }
 0x13e   : > { %3129 = shalt.err (!%p3126_p4)
}
 0x13f   : > { %s3130_s20 = scalar_lea.vmem %s567_s30, 128  ;;  %s3215_s26 = smov [#allocation18]  }
 0x140   : > { %p3131_p8 = scmp.ne.s32.totalorder %s567_s30, %s3130_s20  ;;  %s3135_s24 = sshll.u32 %s3215_s26, 4  ;;  %s3136_s24 = int_to_ptr.vmem [resolvable:$false] %s3135_s24 }
 0x141   : > { %s3137_s5 = scalar_lea.vmem %s3136_s24, 256  ;;  %p3138_p6 = scmp.lt.s32.totalorder %s567_s30, %s3136_s24 }
 0x142   : > { %p3133_p9 = pnand %p3131_p8, %p4314_p12  ;;  %p3139_p11 = scmp.lt.s32.totalorder %s3137_s5, %s3130_s20 }
 0x144   : > { %p3134_p1 = pneg %p3133_p9  ;;  %p3140_p10 = por %p3139_p11, %p3138_p6 }
 0x146   : > { %p3141_p0 = pnand %p3140_p10, %p3134_p1 }
 0x148   : > { %3144 = shalt.err (!%p3141_p0)
}
 0x149   : > { %p4323_p7 = scmp.ne.s32.totalorder %s4301_s15, 0  ;;  %s4324_s13 = scalar_lea.sflag [#allocation17], %s3312_s25 }
 0x14a   : > { %p4325_p5 = scmp.ne.s32.totalorder %s4311_s1, 0 }
 0x14b   : > { %2774 = dma.hbm_to_vmem [thread:$0]  (!%p4323_p7), %s564_s14, 128, %s567_s30, %s4324_s13  }
 0x14c   : > { %575 = sbr.rel (%p4325_p5) target bundleno = 1523 (0x5f3), region = 64  ;;  %p4326_p12 = scmp.eq.s32.totalorder (!%p4325_p5), %s3511_s28, 0 }
 0x153   : > { %3162 = dma.done.wait (%p4326_p12), [#allocation3], 16   ;;  %p4327_p2 = pmov %p4326_p12 }
 0x154   : > { %s3696_s23 = sand.u32 1, %s3511_s28   ;;  %s3699_s17 = sand.u32 1, %s3191_s18  }
 0x155   : > { %3164 = vsyncadd (%p4327_p2), [#allocation3], 4294967280  ;;  %s2236_s25 = sshll.u32 %s3699_s17, 6  ;;  %s582_s15 = scalar_lea.sflag [#allocation5], %s3696_s23 }
 0x156   : > { %s3703_s16 = scalar_lea.vmem [#allocation4], %s2236_s25  ;;  %p4328_p10 = scmp.ne.s32.totalorder %s4310_s22, 0 }
 0x158   : > { %3166 = dma.done.wait (%p4328_p10), %s582_s15, 1056  }
 0x159   : > { %3168 = vsyncadd (%p4328_p10), %s582_s15, 4294966240  ;;  %s3710_s1 = sshll.u32 %s3699_s17, 1  ;;  %s2238_s0 = sshll.u32 %s3699_s17, 9 }
 0x15a   : > { %s594_s12 = scalar_lea.vmem [#allocation6], %s3710_s1  ;;  %s600_s30 = scalar_lea.sflag [#allocation8], %s3696_s23 }
 0x15b   : > { %s3715_s9 = scalar_lea.vmem [#allocation7], %s2238_s0 }
 0x15c   : > { %3170 = dma.done.wait (%p4328_p10), %s600_s30, 8224  }
 0x15d   : > { %3172 = vsyncadd (%p4328_p10), %s600_s30, 4294959072  ;;  %s612_s27 = scalar_lea.vmem [#allocation9], %s3710_s1  ;;  %s618_s14 = scalar_lea.sflag [#allocation11], %s3696_s23 }
 0x15e   : > { %s3723_s11 = scalar_lea.vmem [#allocation10], %s2238_s0 }
 0x15f   : > { %3174 = dma.done.wait (%p4328_p10), %s618_s14, 8224  }
 0x160   : > { %3176 = vsyncadd (%p4328_p10), %s618_s14, 4294959072  ;;  %s630_s7 = scalar_lea.vmem [#allocation12], %s3710_s1  ;;  %s636_s19 = scalar_lea.sflag [#allocation14], %s3696_s23 }
 0x161   : > { %s3731_s21 = scalar_lea.vmem [#allocation13], %s2238_s0 }
 0x162   : > { %3178 = dma.done.wait (%p4328_p10), %s636_s19, 8224  }
 0x163   : > { %3180 = vsyncadd (%p4328_p10), %s636_s19, 4294959072  ;;  %s2244_s3 = sshll.u32 %s3699_s17, 11  ;;  %s648_s29 = scalar_lea.vmem [#allocation15], %s3710_s1 }
 0x164   : > { %s654_s20 = scalar_lea.sflag [#allocation17], %s3696_s23  ;;  %s3740_s26 = scalar_lea.vmem [#allocation16], %s2244_s3 }
 0x165   : > { %3182 = dma.done.wait (%p4328_p10), %s654_s20, 32896  }
 0x166   : > { %3184 = vsyncadd (%p4328_p10), %s654_s20, 4294934400  ;;  %v3216_v0 = vmov 0.0   ;;  %v755_v1 = vld [vmem:[%s3703_s16 + $0x8] sm:$0xff]  ;;  %v757_v2 = vld [vmem:[%s3703_s16 + $0x18] sm:$0xff]  ;;  %vm774_vm0 = vcmask 261120   ;;  %s2245_s22 = sshll.u32 %s3699_s17, 3 }
 0x167   : > { %842 = vmatprep.mubr.f32.mxu0 %v3216_v0  ;;  %v754_v3 = vld [vmem:[%s3703_s16] sm:$0xff]  ;;  %v2260_v4 = vpack.c.bf16 %v757_v2, %v755_v1  ;;  %v756_v5 = vld [vmem:[%s3703_s16 + $0x10] sm:$0xff]  ;;  %v759_v6 = vld [vmem:[%s3703_s16 + $0x28] sm:$0xff]  ;;  %s666_s24 = scalar_lea.vmem [#allocation18], %s2245_s22  ;;  %p749_p13 = scmp.lt.s32.totalorder %s3511_s28, 3 }
 0x168   : > { %v761_v7 = vld [vmem:[%s3703_s16 + $0x38] sm:$0xff]  ;;  %v2262_v8 = vpack.c.bf16 %v756_v5, %v754_v3  ;;  %v758_v10 = vld [vmem:[%s3703_s16 + $0x20] sm:$0xff]  ;;  %v760_v11 = vld [vmem:[%s3703_s16 + $0x30] sm:$0xff]  ;;  %s4329_s17 = sld [smem:[#allocation34_spill]] }
 0x169   : > { %v2264_v9 = vpack.c.bf16 %v761_v7, %v759_v6  ;;  %2261 = vmatprep.subr.bf16.mxu0 %v2260_v4  ;;  %v850_v12 = vld [vmem:[%s3715_s9 + $0x8] sm:$0xff]  ;;  %v852_v13 = vld [vmem:[%s3715_s9 + $0x18] sm:$0xff]  ;;  %v849_v14 = vld [vmem:[%s3715_s9] sm:$0xff]  ;;  %v2266_v15 = vpack.c.bf16 %v760_v11, %v758_v10  ;;  %s4336_s28 = smov (!%p749_p13, %s3511_s28), 3 }
 0x16a   : > { %2263 = vmatpush1.bf16.msra.mxu0 %v2262_v8  ;;  %v2268_v16 = vpack.c.bf16 %v852_v13, %v850_v12  ;;  %v851_v17 = vld [vmem:[%s3715_s9 + $0x10] sm:$0xff]  ;;  %v854_v18 = vld [vmem:[%s3715_s9 + $0x28] sm:$0xff]  ;;  %v856_v19 = vld [vmem:[%s3715_s9 + $0x38] sm:$0xff]  ;;  %s2246_s5 = sshll.u32 %s4336_s28, 3 }
 0x16b   : > { %2265 = vmatprep.subr.bf16.mxu0 %v2264_v9  ;;  %v2270_v20 = vpack.c.bf16 %v851_v17, %v849_v14  ;;  %v2272_v21 = vpack.c.bf16 %v856_v19, %v854_v18  ;;  %v853_v22 = vld [vmem:[%s3715_s9 + $0x20] sm:$0xff]  ;;  %v855_v23 = vld [vmem:[%s3715_s9 + $0x30] sm:$0xff]  ;;  %v858_v24 = vld [vmem:[%s3715_s9 + $0x48] sm:$0xff] }
 0x16c   : > { %2269 = vmatprep.subr.bf16.mxu1 %v2268_v16  ;;  %v860_v25 = vld [vmem:[%s3715_s9 + $0x58] sm:$0xff]  ;;  %v2274_v26 = vpack.c.bf16 %v855_v23, %v853_v22  ;;  %v857_v29 = vld [vmem:[%s3715_s9 + $0x40] sm:$0xff]  ;;  %v859_v30 = vld [vmem:[%s3715_s9 + $0x50] sm:$0xff] }
 0x16d   : > { %2271 = vmatpush1.bf16.msra.mxu1 %v2270_v20  ;;  %v753_v27 = vld [vmem:[#allocation2] sm:$0x1]  ;;  %v2276_v28 = vpack.c.bf16 %v860_v25, %v858_v24  ;;  %v862_v31 = vld [vmem:[%s3715_s9 + $0x68] sm:$0xff]  ;;  %v2278_v33 = vpack.c.bf16 %v859_v30, %v857_v29  ;;  %v861_v35 = vld [vmem:[%s3715_s9 + $0x60] sm:$0xff] }
 0x16e   : > { %2267 = vmatpush1.bf16.msra.mxu0 %v2266_v15  ;;  %2273 = vmatprep.subr.bf16.mxu1 %v2272_v21  ;;  %v864_v32 = vld [vmem:[%s3715_s9 + $0x78] sm:$0xff]  ;;  %v863_v36 = vld [vmem:[%s3715_s9 + $0x70] sm:$0xff]  ;;  %v866_v37 = vld [vmem:[%s3715_s9 + $0x88] sm:$0xff]  ;;  %s752_s25 = scalar_lea.vmem %s4329_s17, %s2246_s5 }
 0x16f   : > { %v2280_v34 = vpack.c.bf16 %v864_v32, %v862_v31  ;;  %v868_v38 = vld [vmem:[%s3715_s9 + $0x98] sm:$0xff]  ;;  %v2282_v39 = vpack.c.bf16 %v863_v36, %v861_v35  ;;  %v865_v41 = vld [vmem:[%s3715_s9 + $0x80] sm:$0xff]  ;;  %v867_v42 = vld [vmem:[%s3715_s9 + $0x90] sm:$0xff] }
 0x170   : > { %v2284_v40 = vpack.c.bf16 %v868_v38, %v866_v37  ;;  %v870_v43 = vld [vmem:[%s3715_s9 + $0xa8] sm:$0xff]  ;;  %v872_v44 = vld [vmem:[%s3715_s9 + $0xb8] sm:$0xff]  ;;  %v2286_v45 = vpack.c.bf16 %v867_v42, %v865_v41  ;;  %v869_v47 = vld [vmem:[%s3715_s9 + $0xa0] sm:$0xff] }
 0x171   : > { %2247 = vmatmul.mubr.msk.f32.vlgmr.msra.gmra.mrb[0].mxu0 %vm774_vm0, %v753_v27  ;;  %2275 = vmatpush1.bf16.msra.mxu1 %v2274_v26  ;;  %v2288_v46 = vpack.c.bf16 %v872_v44, %v870_v43  ;;  %v871_v48 = vld [vmem:[%s3715_s9 + $0xb0] sm:$0xff]  ;;  %v874_v49 = vld [vmem:[%s3715_s9 + $0xc8] sm:$0xff]  ;;  %v876_v50 = vld [vmem:[%s3715_s9 + $0xd8] sm:$0xff] }
 0x172   : > { %2277 = vmatprep.subr.bf16.mxu1 %v2276_v28  ;;  %v2290_v51 = vpack.c.bf16 %v871_v48, %v869_v47  ;;  %v2292_v52 = vpack.c.bf16 %v876_v50, %v874_v49  ;;  %v873_v53 = vld [vmem:[%s3715_s9 + $0xc0] sm:$0xff]  ;;  %v875_v54 = vld [vmem:[%s3715_s9 + $0xd0] sm:$0xff]  ;;  %v878_v55 = vld [vmem:[%s3715_s9 + $0xe8] sm:$0xff] }
 0x173   : > { %v880_v56 = vld [vmem:[%s3715_s9 + $0xf8] sm:$0xff]  ;;  %v2294_v57 = vpack.c.bf16 %v875_v54, %v873_v53  ;;  %v877_v59 = vld [vmem:[%s3715_s9 + $0xe0] sm:$0xff]  ;;  %v879_v60 = vld [vmem:[%s3715_s9 + $0xf0] sm:$0xff] }
 0x174   : > { %v2296_v58 = vpack.c.bf16 %v880_v56, %v878_v55  ;;  %v882_v61 = vld [vmem:[%s3715_s9 + $0x108] sm:$0xff]  ;;  %v884_v62 = vld [vmem:[%s3715_s9 + $0x118] sm:$0xff]  ;;  %v2298_v63 = vpack.c.bf16 %v879_v60, %v877_v59  ;;  %v881_v1 = vld [vmem:[%s3715_s9 + $0x100] sm:$0xff] }
 0x175   : > { %2279 = vmatpush1.bf16.msra.mxu1 %v2278_v33  ;;  %v2300_v0 = vpack.c.bf16 %v884_v62, %v882_v61  ;;  %v883_v2 = vld [vmem:[%s3715_s9 + $0x110] sm:$0xff]  ;;  %v886_v3 = vld [vmem:[%s3715_s9 + $0x128] sm:$0xff]  ;;  %v888_v4 = vld [vmem:[%s3715_s9 + $0x138] sm:$0xff] }
 0x176   : > { %2281 = vmatprep.subr.bf16.mxu1 %v2280_v34  ;;  %v2302_v5 = vpack.c.bf16 %v883_v2, %v881_v1  ;;  %v2304_v6 = vpack.c.bf16 %v888_v4, %v886_v3  ;;  %v885_v7 = vld [vmem:[%s3715_s9 + $0x120] sm:$0xff]  ;;  %v887_v8 = vld [vmem:[%s3715_s9 + $0x130] sm:$0xff]  ;;  %v890_v9 = vld [vmem:[%s3715_s9 + $0x148] sm:$0xff] }
 0x177   : > { %v892_v10 = vld [vmem:[%s3715_s9 + $0x158] sm:$0xff]  ;;  %v2306_v11 = vpack.c.bf16 %v887_v8, %v885_v7  ;;  %v889_v13 = vld [vmem:[%s3715_s9 + $0x140] sm:$0xff]  ;;  %v891_v14 = vld [vmem:[%s3715_s9 + $0x150] sm:$0xff] }
 0x178   : > { %v2308_v12 = vpack.c.bf16 %v892_v10, %v890_v9  ;;  %v894_v15 = vld [vmem:[%s3715_s9 + $0x168] sm:$0xff]  ;;  %v896_v16 = vld [vmem:[%s3715_s9 + $0x178] sm:$0xff]  ;;  %v2310_v17 = vpack.c.bf16 %v891_v14, %v889_v13  ;;  %v893_v19 = vld [vmem:[%s3715_s9 + $0x160] sm:$0xff] }
 0x179   : > { %2283 = vmatpush1.bf16.msra.mxu1 %v2282_v39  ;;  %v2312_v18 = vpack.c.bf16 %v896_v16, %v894_v15  ;;  %v895_v20 = vld [vmem:[%s3715_s9 + $0x170] sm:$0xff]  ;;  %v898_v21 = vld [vmem:[%s3715_s9 + $0x188] sm:$0xff]  ;;  %v900_v22 = vld [vmem:[%s3715_s9 + $0x198] sm:$0xff] }
 0x17a   : > { %2285 = vmatprep.subr.bf16.mxu1 %v2284_v40  ;;  %v2314_v23 = vpack.c.bf16 %v895_v20, %v893_v19  ;;  %v2316_v24 = vpack.c.bf16 %v900_v22, %v898_v21  ;;  %v897_v25 = vld [vmem:[%s3715_s9 + $0x180] sm:$0xff]  ;;  %v899_v26 = vld [vmem:[%s3715_s9 + $0x190] sm:$0xff]  ;;  %v902_v27 = vld [vmem:[%s3715_s9 + $0x1a8] sm:$0xff] }
 0x17b   : > { %v904_v28 = vld [vmem:[%s3715_s9 + $0x1b8] sm:$0xff]  ;;  %v2318_v29 = vpack.c.bf16 %v899_v26, %v897_v25  ;;  %v901_v31 = vld [vmem:[%s3715_s9 + $0x1a0] sm:$0xff]  ;;  %v903_v32 = vld [vmem:[%s3715_s9 + $0x1b0] sm:$0xff] }
 0x17c   : > { %v2320_v30 = vpack.c.bf16 %v904_v28, %v902_v27  ;;  %v906_v33 = vld [vmem:[%s3715_s9 + $0x1c8] sm:$0xff]  ;;  %v908_v34 = vld [vmem:[%s3715_s9 + $0x1d8] sm:$0xff]  ;;  %v2322_v35 = vpack.c.bf16 %v903_v32, %v901_v31  ;;  %v905_v37 = vld [vmem:[%s3715_s9 + $0x1c0] sm:$0xff] }
 0x17d   : > { %2287 = vmatpush1.bf16.msra.mxu1 %v2286_v45  ;;  %v2324_v36 = vpack.c.bf16 %v908_v34, %v906_v33  ;;  %v907_v38 = vld [vmem:[%s3715_s9 + $0x1d0] sm:$0xff]  ;;  %v910_v40 = vld [vmem:[%s3715_s9 + $0x1e8] sm:$0xff]  ;;  %v912_v41 = vld [vmem:[%s3715_s9 + $0x1f8] sm:$0xff] }
 0x17e   : > { %2289 = vmatprep.subr.bf16.mxu1 %v2288_v46  ;;  %v2326_v39 = vpack.c.bf16 %v907_v38, %v905_v37  ;;  %v2328_v42 = vpack.c.bf16 %v912_v41, %v910_v40  ;;  %v909_v43 = vld [vmem:[%s3715_s9 + $0x1e0] sm:$0xff]  ;;  %v911_v44 = vld [vmem:[%s3715_s9 + $0x1f0] sm:$0xff] }
 0x17f   : > { %v2330_v45 = vpack.c.bf16 %v911_v44, %v909_v43  ;;  %v997_v46 = vld [vmem:[%s3723_s11 + $0x8] sm:$0xff]  ;;  %v999_v47 = vld [vmem:[%s3723_s11 + $0x18] sm:$0xff]  ;;  %v996_v48 = vld [vmem:[%s3723_s11] sm:$0xff] }
 0x180   : > { %v2332_v49 = vpack.c.bf16 %v999_v47, %v997_v46  ;;  %v998_v50 = vld [vmem:[%s3723_s11 + $0x10] sm:$0xff]  ;;  %v1000_v55 = vld [vmem:[%s3723_s11 + $0x20] sm:$0xff]  ;;  %v1037_v41 = vld [vmem:[%s3723_s11 + $0x148] sm:$0xff] }
 0x181   : > { %2291 = vmatpush1.bf16.msra.mxu1 %v2290_v51  ;;  %v1001_v51 = vld [vmem:[%s3723_s11 + $0x28] sm:$0xff]  ;;  %v2334_v53 = vpack.c.bf16 %v998_v50, %v996_v48  ;;  %v1002_v56 = vld [vmem:[%s3723_s11 + $0x30] sm:$0xff]  ;;  %v1004_v61 = vld [vmem:[%s3723_s11 + $0x40] sm:$0xff] }
 0x182   : > { %2293 = vmatprep.subr.bf16.mxu1 %v2292_v52  ;;  %v1003_v52 = vld [vmem:[%s3723_s11 + $0x38] sm:$0xff]  ;;  %2333 = vmatprep.subr.bf16.mxu0 %v2332_v49  ;;  %v2338_v59 = vpack.c.bf16 %v1002_v56, %v1000_v55  ;;  %v1006_v62 = vld [vmem:[%s3723_s11 + $0x50] sm:$0xff]  ;;  %v1008_v3 = vld [vmem:[%s3723_s11 + $0x60] sm:$0xff] }
 0x183   : > { %v2336_v54 = vpack.c.bf16 %v1003_v52, %v1001_v51  ;;  %2335 = vmatpush1.bf16.msra.mxu0 %v2334_v53  ;;  %v2342_v1 = vpack.c.bf16 %v1006_v62, %v1004_v61  ;;  %v1010_v4 = vld [vmem:[%s3723_s11 + $0x70] sm:$0xff]  ;;  %v1012_v9 = vld [vmem:[%s3723_s11 + $0x80] sm:$0xff]  ;;  %v1041_v47 = vld [vmem:[%s3723_s11 + $0x168] sm:$0xff] }
 0x184   : > { %v2346_v7 = vpack.c.bf16 %v1010_v4, %v1008_v3  ;;  %v1014_v10 = vld [vmem:[%s3723_s11 + $0x90] sm:$0xff]  ;;  %v1016_v15 = vld [vmem:[%s3723_s11 + $0xa0] sm:$0xff]  ;;  %v1043_v48 = vld [vmem:[%s3723_s11 + $0x178] sm:$0xff] }
 0x185   : > { %2295 = vmatpush1.bf16.msra.mxu1 %v2294_v57  ;;  %v1005_v57 = vld [vmem:[%s3723_s11 + $0x48] sm:$0xff]  ;;  %2337 = vmatprep.subr.bf16.mxu0 %v2336_v54  ;;  %v2350_v13 = vpack.c.bf16 %v1014_v10, %v1012_v9  ;;  %v1018_v16 = vld [vmem:[%s3723_s11 + $0xb0] sm:$0xff]  ;;  %v1020_v21 = vld [vmem:[%s3723_s11 + $0xc0] sm:$0xff]  ;;  %v2376_v50 = vpack.c.bf16 %v1043_v48, %v1041_v47 }
 0x186   : > { %2297 = vmatprep.subr.bf16.mxu1 %v2296_v58  ;;  %v1007_v58 = vld [vmem:[%s3723_s11 + $0x58] sm:$0xff]  ;;  %v2354_v19 = vpack.c.bf16 %v1018_v16, %v1016_v15  ;;  %v1022_v22 = vld [vmem:[%s3723_s11 + $0xd0] sm:$0xff]  ;;  %v1024_v27 = vld [vmem:[%s3723_s11 + $0xe0] sm:$0xff] }
 0x187   : > { %v2340_v60 = vpack.c.bf16 %v1007_v58, %v1005_v57  ;;  %2339 = vmatpush1.bf16.msra.mxu0 %v2338_v59  ;;  %v2358_v25 = vpack.c.bf16 %v1022_v22, %v1020_v21  ;;  %v1026_v28 = vld [vmem:[%s3723_s11 + $0xf0] sm:$0xff]  ;;  %v1028_v33 = vld [vmem:[%s3723_s11 + $0x100] sm:$0xff]  ;;  %v1045_v53 = vld [vmem:[%s3723_s11 + $0x188] sm:$0xff] }
 0x188   : > { %v2362_v31 = vpack.c.bf16 %v1026_v28, %v1024_v27  ;;  %v1030_v34 = vld [vmem:[%s3723_s11 + $0x110] sm:$0xff]  ;;  %v1040_v51 = vld [vmem:[%s3723_s11 + $0x160] sm:$0xff]  ;;  %v1047_v54 = vld [vmem:[%s3723_s11 + $0x198] sm:$0xff] }
 0x189   : > { %2299 = vmatpush1.bf16.msra.mxu1 %v2298_v63  ;;  %v1009_v63 = vld [vmem:[%s3723_s11 + $0x68] sm:$0xff]  ;;  %2341 = vmatprep.subr.bf16.mxu0 %v2340_v60  ;;  %v2366_v37 = vpack.c.bf16 %v1030_v34, %v1028_v33  ;;  %v1034_v40 = vld [vmem:[%s3723_s11 + $0x130] sm:$0xff]  ;;  %v2380_v56 = vpack.c.bf16 %v1047_v54, %v1045_v53  ;;  %v1044_v57 = vld [vmem:[%s3723_s11 + $0x180] sm:$0xff] }
 0x18a   : > { %2301 = vmatprep.subr.bf16.mxu1 %v2300_v0  ;;  %v1011_v0 = vld [vmem:[%s3723_s11 + $0x78] sm:$0xff]  ;;  %v1038_v46 = vld [vmem:[%s3723_s11 + $0x150] sm:$0xff]  ;;  %v1049_v59 = vld [vmem:[%s3723_s11 + $0x1a8] sm:$0xff] }
 0x18b   : > { %v2344_v2 = vpack.c.bf16 %v1011_v0, %v1009_v63  ;;  %2343 = vmatpush1.bf16.msra.mxu0 %v2342_v1  ;;  %v1042_v52 = vld [vmem:[%s3723_s11 + $0x170] sm:$0xff]  ;;  %v1051_v60 = vld [vmem:[%s3723_s11 + $0x1b8] sm:$0xff]  ;;  %v1048_v63 = vld [vmem:[%s3723_s11 + $0x1a0] sm:$0xff] }
 0x18c   : > { %v2378_v55 = vpack.c.bf16 %v1042_v52, %v1040_v51  ;;  %v1046_v58 = vld [vmem:[%s3723_s11 + $0x190] sm:$0xff]  ;;  %v2384_v62 = vpack.c.bf16 %v1051_v60, %v1049_v59  ;;  %v1053_v1 = vld [vmem:[%s3723_s11 + $0x1c8] sm:$0xff]  ;;  %v1056_v22 = vld [vmem:[%s3723_s11 + $0x1e0] sm:$0xff] }
 0x18d   : > { %2303 = vmatpush1.bf16.msra.mxu1 %v2302_v5  ;;  %v1013_v5 = vld [vmem:[%s3723_s11 + $0x88] sm:$0xff]  ;;  %2345 = vmatprep.subr.bf16.mxu0 %v2344_v2  ;;  %v2382_v61 = vpack.c.bf16 %v1046_v58, %v1044_v57  ;;  %v1050_v0 = vld [vmem:[%s3723_s11 + $0x1b0] sm:$0xff]  ;;  %v1055_v2 = vld [vmem:[%s3723_s11 + $0x1d8] sm:$0xff] }
 0x18e   : > { %2305 = vmatprep.subr.bf16.mxu1 %v2304_v6  ;;  %v1015_v6 = vld [vmem:[%s3723_s11 + $0x98] sm:$0xff]  ;;  %v2386_v3 = vpack.c.bf16 %v1050_v0, %v1048_v63  ;;  %v2388_v4 = vpack.c.bf16 %v1055_v2, %v1053_v1  ;;  %v1143_v27 = vld [vmem:[%s3731_s21] sm:$0xff]  ;;  %v1160_v48 = vld [vmem:[%s3731_s21 + $0x88] sm:$0xff] }
 0x18f   : > { %v2348_v8 = vpack.c.bf16 %v1015_v6, %v1013_v5  ;;  %2347 = vmatpush1.bf16.msra.mxu0 %v2346_v7  ;;  %v1052_v5 = vld [vmem:[%s3723_s11 + $0x1c0] sm:$0xff]  ;;  %v1054_v6 = vld [vmem:[%s3723_s11 + $0x1d0] sm:$0xff] }
 0x190   : > { %v2390_v7 = vpack.c.bf16 %v1054_v6, %v1052_v5  ;;  %v1147_v34 = vld [vmem:[%s3731_s21 + $0x20] sm:$0xff]  ;;  %v1157_v47 = vld [vmem:[%s3731_s21 + $0x70] sm:$0xff]  ;;  %v1164_v54 = vld [vmem:[%s3731_s21 + $0xa8] sm:$0xff] }
 0x191   : > { %2307 = vmatpush1.bf16.msra.mxu1 %v2306_v11  ;;  %v1017_v11 = vld [vmem:[%s3723_s11 + $0xa8] sm:$0xff]  ;;  %2349 = vmatprep.subr.bf16.mxu0 %v2348_v8  ;;  %v764_v8 = vlaneseq  ;;  %v1161_v53 = vld [vmem:[%s3731_s21 + $0x90] sm:$0xff] }
 0x192   : > { %2309 = vmatprep.subr.bf16.mxu1 %v2308_v12  ;;  %v1019_v12 = vld [vmem:[%s3723_s11 + $0xb8] sm:$0xff]  ;;  %v1159_v52 = vld [vmem:[%s3731_s21 + $0x80] sm:$0xff]  ;;  %v1168_v60 = vld [vmem:[%s3731_s21 + $0xc8] sm:$0xff] }
 0x193   : > { %v2352_v14 = vpack.c.bf16 %v1019_v12, %v1017_v11  ;;  %2351 = vmatpush1.bf16.msra.mxu0 %v2350_v13  ;;  %v3878_v9 = vshrl.u32 %v764_v8, 7  ;;  %v762_v11 = vld [vmem:[%s594_s12] sm:$0x3]  ;;  %v1163_v58 = vld [vmem:[%s3731_s21 + $0xa0] sm:$0xff]  ;;  %v1172_v2 = vld [vmem:[%s3731_s21 + $0xe8] sm:$0xff] }
 0x194   : > { %v1165_v59 = vld [vmem:[%s3731_s21 + $0xb0] sm:$0xff]  ;;  %v1167_v0 = vld [vmem:[%s3731_s21 + $0xc0] sm:$0xff]  ;;  %v1176_v8 = vld [vmem:[%s3731_s21 + $0x108] sm:$0xff] }
 0x195   : > { %2311 = vmatpush1.bf16.msra.mxu1 %v2310_v17  ;;  %v1021_v17 = vld [vmem:[%s3723_s11 + $0xc8] sm:$0xff]  ;;  %2353 = vmatprep.subr.bf16.mxu0 %v2352_v14  ;;  %v3881_v10 = vsub.s32 1, %v3878_v9  ;;  %v3886_v12 = vsub.s32 0, %v3878_v9  ;;  %v1169_v1 = vld [vmem:[%s3731_s21 + $0xd0] sm:$0xff] }
 0x196   : > { %2313 = vmatprep.subr.bf16.mxu1 %v2312_v18  ;;  %v1023_v18 = vld [vmem:[%s3723_s11 + $0xd8] sm:$0xff]  ;;  %v1171_v6 = vld [vmem:[%s3731_s21 + $0xe0] sm:$0xff] }
 0x197   : > { %v2356_v20 = vpack.c.bf16 %v1023_v18, %v1021_v17  ;;  %2355 = vmatpush1.bf16.msra.mxu0 %v2354_v19  ;;  %v771_v13 = vrot.slane %v762_v11, %v3881_v10  ;;  %v767_v14 = vrot.slane %v762_v11, %v3886_v12  ;;  %v1057_v19 = vld [vmem:[%s3723_s11 + $0x1e8] sm:$0xff]  ;;  %v1178_v11 = vld [vmem:[%s3731_s21 + $0x118] sm:$0xff] }
 0x199   : > { %2315 = vmatpush1.bf16.msra.mxu1 %v2314_v23  ;;  %v1025_v23 = vld [vmem:[%s3723_s11 + $0xe8] sm:$0xff]  ;;  %2357 = vmatprep.subr.bf16.mxu0 %v2356_v20  ;;  %v1059_v20 = vld [vmem:[%s3723_s11 + $0x1f8] sm:$0xff] }
 0x19a   : > { %2317 = vmatprep.subr.bf16.mxu1 %v2316_v24  ;;  %v1027_v24 = vld [vmem:[%s3723_s11 + $0xf8] sm:$0xff]  ;;  %v2392_v21 = vpack.c.bf16 %v1059_v20, %v1057_v19 }
 0x19b   : > { %v2360_v26 = vpack.c.bf16 %v1027_v24, %v1025_v23  ;;  %2359 = vmatpush1.bf16.msra.mxu0 %v2358_v25  ;;  %v1058_v23 = vld [vmem:[%s3723_s11 + $0x1f0] sm:$0xff] }
 0x19c   : > { %v2394_v24 = vpack.c.bf16 %v1058_v23, %v1056_v22  ;;  %v1144_v25 = vld [vmem:[%s3731_s21 + $0x8] sm:$0xff]  ;;  %v1181_v22 = vld [vmem:[%s3731_s21 + $0x130] sm:$0xff] }
 0x19d   : > { %2319 = vmatpush1.bf16.msra.mxu1 %v2318_v29  ;;  %v1029_v29 = vld [vmem:[%s3723_s11 + $0x108] sm:$0xff]  ;;  %2361 = vmatprep.subr.bf16.mxu0 %v2360_v26  ;;  %v1146_v26 = vld [vmem:[%s3731_s21 + $0x18] sm:$0xff] }
 0x19e   : > { %2321 = vmatprep.subr.bf16.mxu1 %v2320_v30  ;;  %v1031_v30 = vld [vmem:[%s3723_s11 + $0x118] sm:$0xff]  ;;  %v2396_v28 = vpack.c.bf16 %v1146_v26, %v1144_v25  ;;  %v1184_v23 = vld [vmem:[%s3731_s21 + $0x148] sm:$0xff] }
 0x19f   : > { %v2364_v32 = vpack.c.bf16 %v1031_v30, %v1029_v29  ;;  %2363 = vmatpush1.bf16.msra.mxu0 %v2362_v31  ;;  %v1145_v29 = vld [vmem:[%s3731_s21 + $0x10] sm:$0xff]  ;;  %v1148_v30 = vld [vmem:[%s3731_s21 + $0x28] sm:$0xff]  ;;  %v1150_v31 = vld [vmem:[%s3731_s21 + $0x38] sm:$0xff] }
 0x1a0   : > { %v2400_v33 = vpack.c.bf16 %v1150_v31, %v1148_v30  ;;  %v1190_v30 = vld [vmem:[%s3731_s21 + $0x178] sm:$0xff] }
 0x1a1   : > { %2323 = vmatpush1.bf16.msra.mxu1 %v2322_v35  ;;  %v1033_v35 = vld [vmem:[%s3723_s11 + $0x128] sm:$0xff]  ;;  %2365 = vmatprep.subr.bf16.mxu0 %v2364_v32  ;;  %v2398_v32 = vpack.c.bf16 %v1145_v29, %v1143_v27 }
 0x1a2   : > { %2325 = vmatprep.subr.bf16.mxu1 %v2324_v36  ;;  %v1035_v36 = vld [vmem:[%s3723_s11 + $0x138] sm:$0xff]  ;;  %v1183_v27 = vld [vmem:[%s3731_s21 + $0x140] sm:$0xff]  ;;  %v1188_v29 = vld [vmem:[%s3731_s21 + $0x168] sm:$0xff] }
 0x1a3   : > { %v2368_v38 = vpack.c.bf16 %v1035_v36, %v1033_v35  ;;  %2367 = vmatpush1.bf16.msra.mxu0 %v2366_v37  ;;  %v1149_v35 = vld [vmem:[%s3731_s21 + $0x30] sm:$0xff]  ;;  %v1152_v36 = vld [vmem:[%s3731_s21 + $0x48] sm:$0xff]  ;;  %v1154_v37 = vld [vmem:[%s3731_s21 + $0x58] sm:$0xff] }
 0x1a5   : > { %2327 = vmatpush1.bf16.msra.mxu1 %v2326_v39  ;;  %v1032_v39 = vld [vmem:[%s3723_s11 + $0x120] sm:$0xff]  ;;  %2369 = vmatprep.subr.bf16.mxu0 %v2368_v38  ;;  %v2402_v38 = vpack.c.bf16 %v1149_v35, %v1147_v34  ;;  %v1189_v34 = vld [vmem:[%s3731_s21 + $0x170] sm:$0xff]  ;;  %v1192_v35 = vld [vmem:[%s3731_s21 + $0x188] sm:$0xff] }
 0x1a6   : > { %2329 = vmatprep.subr.bf16.mxu1 %v2328_v42  ;;  %v1039_v42 = vld [vmem:[%s3723_s11 + $0x158] sm:$0xff]  ;;  %v2370_v43 = vpack.c.bf16 %v1034_v40, %v1032_v39  ;;  %v2404_v39 = vpack.c.bf16 %v1154_v37, %v1152_v36  ;;  %v1151_v40 = vld [vmem:[%s3731_s21 + $0x40] sm:$0xff] }
 0x1a7   : > { %v2372_v44 = vpack.c.bf16 %v1039_v42, %v1037_v41  ;;  %v1153_v41 = vld [vmem:[%s3731_s21 + $0x50] sm:$0xff]  ;;  %v1156_v42 = vld [vmem:[%s3731_s21 + $0x68] sm:$0xff]  ;;  %v1194_v36 = vld [vmem:[%s3731_s21 + $0x198] sm:$0xff] }
 0x1a8   : > { %2371 = vmatpush1.bf16.msra.mxu0 %v2370_v43  ;;  %v1158_v43 = vld [vmem:[%s3731_s21 + $0x78] sm:$0xff] }
 0x1a9   : > { %2331 = vmatpush1.bf16.msra.mxu1 %v2330_v45  ;;  %v1036_v45 = vld [vmem:[%s3723_s11 + $0x140] sm:$0xff]  ;;  %2373 = vmatprep.subr.bf16.mxu0 %v2372_v44  ;;  %v2406_v44 = vpack.c.bf16 %v1153_v41, %v1151_v40  ;;  %v1193_v40 = vld [vmem:[%s3731_s21 + $0x190] sm:$0xff]  ;;  %v1196_v41 = vld [vmem:[%s3731_s21 + $0x1a8] sm:$0xff] }
 0x1aa   : > { %v2374_v49 = vpack.c.bf16 %v1038_v46, %v1036_v45  ;;  %2397 = vmatprep.subr.bf16.mxu1 %v2396_v28  ;;  %v2408_v45 = vpack.c.bf16 %v1158_v43, %v1156_v42  ;;  %v1155_v46 = vld [vmem:[%s3731_s21 + $0x60] sm:$0xff]  ;;  %v1185_v28 = vld [vmem:[%s3731_s21 + $0x150] sm:$0xff]  ;;  %v1198_v42 = vld [vmem:[%s3731_s21 + $0x1b8] sm:$0xff] }
 0x1ab   : > { %v2438_v31 = vpack.c.bf16 %v1185_v28, %v1183_v27  ;;  %v1339_v27 = vld [vmem:[%s3740_s26 + $0x188] sm:$0xff] }
 0x1ac   : > { %2375 = vmatpush1.bf16.msra.mxu0 %v2374_v49  ;;  %v1162_v49 = vld [vmem:[%s3731_s21 + $0x98] sm:$0xff]  ;;  %v1347_v28 = vld [vmem:[%s3740_s26 + $0x1c8] sm:$0xff] }
 0x1ad   : > { %2377 = vmatprep.subr.bf16.mxu0 %v2376_v50  ;;  %v2410_v50 = vpack.c.bf16 %v1157_v47, %v1155_v46  ;;  %v2412_v51 = vpack.c.bf16 %v1162_v49, %v1160_v48  ;;  %v1197_v46 = vld [vmem:[%s3731_s21 + $0x1b0] sm:$0xff]  ;;  %v1200_v47 = vld [vmem:[%s3731_s21 + $0x1c8] sm:$0xff]  ;;  %v1202_v48 = vld [vmem:[%s3731_s21 + $0x1d8] sm:$0xff] }
 0x1b0   : > { %2379 = vmatpush1.bf16.msra.mxu0 %v2378_v55  ;;  %v1166_v55 = vld [vmem:[%s3731_s21 + $0xb8] sm:$0xff] }
 0x1b1   : > { %2381 = vmatprep.subr.bf16.mxu0 %v2380_v56  ;;  %v2414_v56 = vpack.c.bf16 %v1161_v53, %v1159_v52  ;;  %v2416_v57 = vpack.c.bf16 %v1166_v55, %v1164_v54  ;;  %v1201_v52 = vld [vmem:[%s3731_s21 + $0x1d0] sm:$0xff]  ;;  %v913_v54 = vld [vmem:[%s612_s27] sm:$0x3] }
 0x1b2   : > { %v922_v55 = vrot.slane %v913_v54, %v3881_v10 }
 0x1b4   : > { %2383 = vmatpush1.bf16.msra.mxu0 %v2382_v61  ;;  %v1170_v61 = vld [vmem:[%s3731_s21 + $0xd8] sm:$0xff] }
 0x1b5   : > { %2385 = vmatprep.subr.bf16.mxu0 %v2384_v62  ;;  %v2418_v62 = vpack.c.bf16 %v1165_v59, %v1163_v58  ;;  %v2420_v63 = vpack.c.bf16 %v1170_v61, %v1168_v60  ;;  %v1204_v61 = vld [vmem:[%s3731_s21 + $0x1e8] sm:$0xff] }
 0x1b8   : > { %2387 = vmatpush1.bf16.msra.mxu0 %v2386_v3  ;;  %v1174_v3 = vld [vmem:[%s3731_s21 + $0xf8] sm:$0xff] }
 0x1b9   : > { %2389 = vmatprep.subr.bf16.mxu0 %v2388_v4  ;;  %v2422_v4 = vpack.c.bf16 %v1169_v1, %v1167_v0  ;;  %v2424_v5 = vpack.c.bf16 %v1174_v3, %v1172_v2  ;;  %v1203_v0 = vld [vmem:[%s3731_s21 + $0x1e0] sm:$0xff]  ;;  %v1205_v1 = vld [vmem:[%s3731_s21 + $0x1f0] sm:$0xff] }
 0x1ba   : > { %v2458_v2 = vpack.c.bf16 %v1205_v1, %v1203_v0  ;;  %v1291_v3 = vld [vmem:[%s3740_s26 + $0x8] sm:$0xff] }
 0x1bb   : > { %v1443_v0 = vld [vmem:[%s3740_s26 + $0x4c8] sm:$0xff] }
 0x1bc   : > { %2391 = vmatpush1.bf16.msra.mxu0 %v2390_v7  ;;  %v1173_v7 = vld [vmem:[%s3731_s21 + $0xf0] sm:$0xff] }
 0x1bd   : > { %2393 = vmatprep.subr.bf16.mxu0 %v2392_v21  ;;  %v1179_v21 = vld [vmem:[%s3731_s21 + $0x120] sm:$0xff] }
 0x1be   : > { %v2434_v25 = vpack.c.bf16 %v1181_v22, %v1179_v21  ;;  %v1323_v21 = vld [vmem:[%s3740_s26 + $0x108] sm:$0xff] }
 0x1bf   : > { %v1331_v22 = vld [vmem:[%s3740_s26 + $0x148] sm:$0xff] }
 0x1c0   : > { %2395 = vmatpush1.bf16.msra.mxu0 %v2394_v24  ;;  %v1186_v24 = vld [vmem:[%s3731_s21 + $0x158] sm:$0xff] }
 0x1c1   : > { %v2436_v26 = vpack.c.bf16 %v1186_v24, %v1184_v23  ;;  %v2468_v23 = vpack.c.bf16 %v1331_v22, %v1323_v21  ;;  %v1322_v24 = vld [vmem:[%s3740_s26 + $0x100] sm:$0xff]  ;;  %v1491_v21 = vld [vmem:[%s3740_s26 + $0x648] sm:$0xff] }
 0x244   : > { %v844_v15 = vpop.f32.mrb[0].mxu0 }
 0x245   : > { %v846_v16 = vpop.f32.mrb[1].mxu0  ;;  %v845_v18 = vadd.f32 %v844_v15, %v767_v14  ;;  %v2428_v14 = vpack.c.bf16 %v1178_v11, %v1176_v8  ;;  %v1175_v15 = vld [vmem:[%s3731_s21 + $0x100] sm:$0xff] }
 0x246   : > { %v847_v17 = vadd.f32 %v846_v16, %v771_v13  ;;  %v2426_v13 = vpack.c.bf16 %v1173_v7, %v1171_v6  ;;  %v1177_v16 = vld [vmem:[%s3731_s21 + $0x110] sm:$0xff]  ;;  %v1301_v7 = vld [vmem:[%s3740_s26 + $0x58] sm:$0xff]  ;;  %v1290_v8 = vld [vmem:[%s3740_s26] sm:$0xff] }
 0x247   : > { %v2430_v19 = vpack.c.bf16 %v1177_v16, %v1175_v15  ;;  %v1298_v11 = vld [vmem:[%s3740_s26 + $0x40] sm:$0xff]  ;;  %v1307_v15 = vld [vmem:[%s3740_s26 + $0x88] sm:$0xff] }
 0x248   : > { %989 = vmatprep.mubr.f32.mxu1 %v847_v17  ;;  %v1180_v17 = vld [vmem:[%s3731_s21 + $0x128] sm:$0xff] }
 0x249   : > { %990 = vmatmul.mubr.f32.vlgmr.msra.gmra.mrb[0].mxu1 %v845_v18  ;;  %v1182_v18 = vld [vmem:[%s3731_s21 + $0x138] sm:$0xff]  ;;  %v1315_v16 = vld [vmem:[%s3740_s26 + $0xc8] sm:$0xff] }
 0x24a   : > { %2399 = vmatpush1.bf16.msra.mxu1 %v2398_v32  ;;  %v2432_v20 = vpack.c.bf16 %v1182_v18, %v1180_v17  ;;  %v2440_v32 = vpack.c.bf16 %v1190_v30, %v1188_v29  ;;  %v2464_v17 = vpack.c.bf16 %v1315_v16, %v1307_v15  ;;  %v1306_v18 = vld [vmem:[%s3740_s26 + $0x80] sm:$0xff]  ;;  %v2472_v29 = vpack.c.bf16 %v1347_v28, %v1339_v27  ;;  %v1475_v15 = vld [vmem:[%s3740_s26 + $0x5c8] sm:$0xff] }
 0x24b   : > { %2401 = vmatprep.subr.bf16.mxu1 %v2400_v33  ;;  %v1187_v33 = vld [vmem:[%s3731_s21 + $0x160] sm:$0xff]  ;;  %v1507_v27 = vld [vmem:[%s3740_s26 + $0x6c8] sm:$0xff] }
 0x24c   : > { %v2442_v37 = vpack.c.bf16 %v1189_v34, %v1187_v33  ;;  %v1338_v30 = vld [vmem:[%s3740_s26 + $0x180] sm:$0xff]  ;;  %v1355_v33 = vld [vmem:[%s3740_s26 + $0x208] sm:$0xff] }
 0x24d   : > { %v1363_v34 = vld [vmem:[%s3740_s26 + $0x248] sm:$0xff] }
 0x24e   : > { %2403 = vmatpush1.bf16.msra.mxu1 %v2402_v38  ;;  %v2444_v38 = vpack.c.bf16 %v1194_v36, %v1192_v35  ;;  %v2476_v35 = vpack.c.bf16 %v1363_v34, %v1355_v33  ;;  %v1354_v36 = vld [vmem:[%s3740_s26 + $0x200] sm:$0xff]  ;;  %v1523_v33 = vld [vmem:[%s3740_s26 + $0x748] sm:$0xff] }
 0x24f   : > { %2405 = vmatprep.subr.bf16.mxu1 %v2404_v39  ;;  %v1191_v39 = vld [vmem:[%s3731_s21 + $0x180] sm:$0xff] }
 0x250   : > { %v2446_v43 = vpack.c.bf16 %v1193_v40, %v1191_v39  ;;  %v1371_v39 = vld [vmem:[%s3740_s26 + $0x288] sm:$0xff] }
 0x251   : > { %v1379_v40 = vld [vmem:[%s3740_s26 + $0x2c8] sm:$0xff] }
 0x252   : > { %2407 = vmatpush1.bf16.msra.mxu1 %v2406_v44  ;;  %v2448_v44 = vpack.c.bf16 %v1198_v42, %v1196_v41  ;;  %v2480_v41 = vpack.c.bf16 %v1379_v40, %v1371_v39  ;;  %v1370_v42 = vld [vmem:[%s3740_s26 + $0x280] sm:$0xff] }
 0x253   : > { %2409 = vmatprep.subr.bf16.mxu1 %v2408_v45  ;;  %v1195_v45 = vld [vmem:[%s3731_s21 + $0x1a0] sm:$0xff] }
 0x254   : > { %v2450_v49 = vpack.c.bf16 %v1197_v46, %v1195_v45  ;;  %v1387_v45 = vld [vmem:[%s3740_s26 + $0x308] sm:$0xff] }
 0x255   : > { %v1395_v46 = vld [vmem:[%s3740_s26 + $0x348] sm:$0xff] }
 0x256   : > { %2411 = vmatpush1.bf16.msra.mxu1 %v2410_v50  ;;  %v2452_v50 = vpack.c.bf16 %v1202_v48, %v1200_v47  ;;  %v2484_v47 = vpack.c.bf16 %v1395_v46, %v1387_v45  ;;  %v1386_v48 = vld [vmem:[%s3740_s26 + $0x300] sm:$0xff]  ;;  %v1317_v45 = vld [vmem:[%s3740_s26 + $0xd8] sm:$0xff] }
 0x257   : > { %2413 = vmatprep.subr.bf16.mxu1 %v2412_v51  ;;  %v1199_v51 = vld [vmem:[%s3731_s21 + $0x1c0] sm:$0xff] }
 0x258   : > { %v2454_v53 = vpack.c.bf16 %v1201_v52, %v1199_v51  ;;  %v1403_v51 = vld [vmem:[%s3740_s26 + $0x388] sm:$0xff] }
 0x259   : > { %v1411_v52 = vld [vmem:[%s3740_s26 + $0x3c8] sm:$0xff] }
 0x25a   : > { %2415 = vmatpush1.bf16.msra.mxu1 %v2414_v56  ;;  %v918_v56 = vrot.slane %v913_v54, %v3886_v12  ;;  %v1402_v54 = vld [vmem:[%s3740_s26 + $0x380] sm:$0xff] }
 0x25b   : > { %2417 = vmatprep.subr.bf16.mxu1 %v2416_v57 }
 0x25e   : > { %2419 = vmatpush1.bf16.msra.mxu1 %v2418_v62  ;;  %v1206_v62 = vld [vmem:[%s3731_s21 + $0x1f8] sm:$0xff] }
 0x25f   : > { %2421 = vmatprep.subr.bf16.mxu1 %v2420_v63  ;;  %v2456_v63 = vpack.c.bf16 %v1206_v62, %v1204_v61  ;;  %v1426_v61 = vld [vmem:[%s3740_s26 + $0x440] sm:$0xff] }
 0x262   : > { %2423 = vmatpush1.bf16.msra.mxu1 %v2422_v4  ;;  %v1299_v4 = vld [vmem:[%s3740_s26 + $0x48] sm:$0xff] }
 0x263   : > { %2425 = vmatprep.subr.bf16.mxu1 %v2424_v5  ;;  %v1293_v5 = vld [vmem:[%s3740_s26 + $0x18] sm:$0xff]  ;;  %v2460_v6 = vpack.c.bf16 %v1299_v4, %v1291_v3  ;;  %v1442_v3 = vld [vmem:[%s3740_s26 + $0x4c0] sm:$0xff] }
 0x265   : > { %2461 = vmatprep.subr.bf16.mxu0 %v2460_v6  ;;  %v1459_v6 = vld [vmem:[%s3740_s26 + $0x548] sm:$0xff] }
 0x266   : > { %2427 = vmatpush1.bf16.msra.mxu1 %v2426_v13  ;;  %v2524_v13 = vpack.c.bf16 %v1301_v7, %v1293_v5  ;;  %v1451_v5 = vld [vmem:[%s3740_s26 + $0x508] sm:$0xff] }
 0x267   : > { %2429 = vmatprep.subr.bf16.mxu1 %v2428_v14  ;;  %v2462_v14 = vpack.c.bf16 %v1298_v11, %v1290_v8  ;;  %v2500_v7 = vpack.c.bf16 %v1459_v6, %v1451_v5  ;;  %v1450_v8 = vld [vmem:[%s3740_s26 + $0x500] sm:$0xff]  ;;  %v1356_v5 = vld [vmem:[%s3740_s26 + $0x210] sm:$0xff] }
 0x268   : > { %v1458_v11 = vld [vmem:[%s3740_s26 + $0x540] sm:$0xff]  ;;  %v1364_v6 = vld [vmem:[%s3740_s26 + $0x250] sm:$0xff] }
 0x26a   : > { %2431 = vmatpush1.bf16.msra.mxu1 %v2430_v19  ;;  %v1314_v19 = vld [vmem:[%s3740_s26 + $0xc0] sm:$0xff] }
 0x26b   : > { %2433 = vmatprep.subr.bf16.mxu1 %v2432_v20  ;;  %v2466_v20 = vpack.c.bf16 %v1314_v19, %v1306_v18  ;;  %v1474_v18 = vld [vmem:[%s3740_s26 + $0x5c0] sm:$0xff] }
 0x26e   : > { %2435 = vmatpush1.bf16.msra.mxu1 %v2434_v25  ;;  %v1330_v25 = vld [vmem:[%s3740_s26 + $0x140] sm:$0xff] }
 0x26f   : > { %2437 = vmatprep.subr.bf16.mxu1 %v2436_v26  ;;  %v2470_v26 = vpack.c.bf16 %v1330_v25, %v1322_v24  ;;  %v1490_v24 = vld [vmem:[%s3740_s26 + $0x640] sm:$0xff] }
 0x272   : > { %2439 = vmatpush1.bf16.msra.mxu1 %v2438_v31  ;;  %v1346_v31 = vld [vmem:[%s3740_s26 + $0x1c0] sm:$0xff] }
 0x273   : > { %2441 = vmatprep.subr.bf16.mxu1 %v2440_v32  ;;  %v2474_v32 = vpack.c.bf16 %v1346_v31, %v1338_v30  ;;  %v1506_v30 = vld [vmem:[%s3740_s26 + $0x6c0] sm:$0xff] }
 0x276   : > { %2443 = vmatpush1.bf16.msra.mxu1 %v2442_v37  ;;  %v1362_v37 = vld [vmem:[%s3740_s26 + $0x240] sm:$0xff] }
 0x277   : > { %2445 = vmatprep.subr.bf16.mxu1 %v2444_v38  ;;  %v2478_v38 = vpack.c.bf16 %v1362_v37, %v1354_v36  ;;  %v1522_v36 = vld [vmem:[%s3740_s26 + $0x740] sm:$0xff] }
 0x27a   : > { %2447 = vmatpush1.bf16.msra.mxu1 %v2446_v43  ;;  %v1378_v43 = vld [vmem:[%s3740_s26 + $0x2c0] sm:$0xff] }
 0x27b   : > { %2449 = vmatprep.subr.bf16.mxu1 %v2448_v44  ;;  %v2482_v44 = vpack.c.bf16 %v1378_v43, %v1370_v42  ;;  %v1300_v42 = vld [vmem:[%s3740_s26 + $0x50] sm:$0xff] }
 0x27e   : > { %2451 = vmatpush1.bf16.msra.mxu1 %v2450_v49  ;;  %v1394_v49 = vld [vmem:[%s3740_s26 + $0x340] sm:$0xff] }
 0x27f   : > { %2453 = vmatprep.subr.bf16.mxu1 %v2452_v50  ;;  %v2486_v50 = vpack.c.bf16 %v1394_v49, %v1386_v48 }
 0x282   : > { %2455 = vmatpush1.bf16.msra.mxu1 %v2454_v53  ;;  %v2488_v53 = vpack.c.bf16 %v1411_v52, %v1403_v51  ;;  %v1308_v51 = vld [vmem:[%s3740_s26 + $0x90] sm:$0xff] }
 0x283   : > { %2457 = vmatprep.subr.bf16.mxu1 %v2456_v63  ;;  %v1435_v63 = vld [vmem:[%s3740_s26 + $0x488] sm:$0xff]  ;;  %v1316_v52 = vld [vmem:[%s3740_s26 + $0xd0] sm:$0xff] }
 0x284   : > { %v2496_v1 = vpack.c.bf16 %v1443_v0, %v1435_v63  ;;  %v1340_v63 = vld [vmem:[%s3740_s26 + $0x190] sm:$0xff] }
 0x285   : > { %v1348_v0 = vld [vmem:[%s3740_s26 + $0x1d0] sm:$0xff] }
 0x286   : > { %2459 = vmatpush1.bf16.msra.mxu1 %v2458_v2  ;;  %v1434_v2 = vld [vmem:[%s3740_s26 + $0x480] sm:$0xff] }
 0x287   : > { %2525 = vmatprep.subr.bf16.mxu1 %v2524_v13  ;;  %v2498_v4 = vpack.c.bf16 %v1442_v3, %v1434_v2  ;;  %v2502_v13 = vpack.c.bf16 %v1458_v11, %v1450_v8  ;;  %v1365_v2 = vld [vmem:[%s3740_s26 + $0x258] sm:$0xff]  ;;  %v2538_v3 = vpack.c.bf16 %v1348_v0, %v1340_v63  ;;  %v2542_v11 = vpack.c.bf16 %v1364_v6, %v1356_v5  ;;  %v1508_v63 = vld [vmem:[%s3740_s26 + $0x6d0] sm:$0xff] }
 0x288   : > { %v1381_v8 = vld [vmem:[%s3740_s26 + $0x2d8] sm:$0xff]  ;;  %v1524_v5 = vld [vmem:[%s3740_s26 + $0x750] sm:$0xff] }
 0x289   : > { %v1517_v0 = vld [vmem:[%s3740_s26 + $0x718] sm:$0xff] }
 0x31c   : > { %v991_v57 = vpop.f32.mrb[0].mxu1 }
 0x31d   : > { %v993_v58 = vpop.f32.mrb[1].mxu1  ;;  %v992_v60 = vadd.f32 %v991_v57, %v918_v56  ;;  %v1419_v57 = vld [vmem:[%s3740_s26 + $0x408] sm:$0xff] }
 0x31e   : > { %v994_v59 = vadd.f32 %v993_v58, %v922_v55  ;;  %v1410_v55 = vld [vmem:[%s3740_s26 + $0x3c0] sm:$0xff]  ;;  %v1427_v58 = vld [vmem:[%s3740_s26 + $0x448] sm:$0xff] }
 0x31f   : > { %v2490_v56 = vpack.c.bf16 %v1410_v55, %v1402_v54  ;;  %v1333_v54 = vld [vmem:[%s3740_s26 + $0x158] sm:$0xff]  ;;  %v2530_v55 = vpack.c.bf16 %v1316_v52, %v1308_v51  ;;  %v1476_v51 = vld [vmem:[%s3740_s26 + $0x5d0] sm:$0xff] }
 0x320   : > { %1136 = vmatprep.mubr.f32.mxu0 %v994_v59  ;;  %v2492_v59 = vpack.c.bf16 %v1427_v58, %v1419_v57  ;;  %v1324_v57 = vld [vmem:[%s3740_s26 + $0x110] sm:$0xff]  ;;  %v1485_v52 = vld [vmem:[%s3740_s26 + $0x618] sm:$0xff] }
 0x321   : > { %1137 = vmatmul.mubr.f32.vlgmr.msra.gmra.mrb[2].mxu0 %v992_v60  ;;  %v1418_v60 = vld [vmem:[%s3740_s26 + $0x400] sm:$0xff]  ;;  %v1332_v58 = vld [vmem:[%s3740_s26 + $0x150] sm:$0xff] }
 0x322   : > { %2463 = vmatpush1.bf16.msra.mxu0 %v2462_v14  ;;  %v2494_v62 = vpack.c.bf16 %v1426_v61, %v1418_v60  ;;  %v1467_v14 = vld [vmem:[%s3740_s26 + $0x588] sm:$0xff]  ;;  %v1349_v60 = vld [vmem:[%s3740_s26 + $0x1d8] sm:$0xff]  ;;  %v2534_v61 = vpack.c.bf16 %v1332_v58, %v1324_v57  ;;  %v1492_v57 = vld [vmem:[%s3740_s26 + $0x650] sm:$0xff] }
 0x323   : > { %2465 = vmatprep.subr.bf16.mxu0 %v2464_v17  ;;  %v2504_v16 = vpack.c.bf16 %v1475_v15, %v1467_v14  ;;  %v1466_v17 = vld [vmem:[%s3740_s26 + $0x580] sm:$0xff]  ;;  %v1372_v14 = vld [vmem:[%s3740_s26 + $0x290] sm:$0xff]  ;;  %v1501_v58 = vld [vmem:[%s3740_s26 + $0x698] sm:$0xff] }
 0x324   : > { %v2506_v19 = vpack.c.bf16 %v1474_v18, %v1466_v17  ;;  %v1380_v15 = vld [vmem:[%s3740_s26 + $0x2d0] sm:$0xff]  ;;  %v1397_v17 = vld [vmem:[%s3740_s26 + $0x358] sm:$0xff] }
 0x325   : > { %v2546_v18 = vpack.c.bf16 %v1380_v15, %v1372_v14  ;;  %v1541_v14 = vld [vmem:[%s3740_s26 + $0x7d8] sm:$0xff]  ;;  %v1530_v15 = vld [vmem:[%s3740_s26 + $0x780] sm:$0xff] }
 0x326   : > { %2467 = vmatpush1.bf16.msra.mxu0 %v2466_v20  ;;  %v1483_v20 = vld [vmem:[%s3740_s26 + $0x608] sm:$0xff] }
 0x327   : > { %2469 = vmatprep.subr.bf16.mxu0 %v2468_v23  ;;  %v2508_v22 = vpack.c.bf16 %v1491_v21, %v1483_v20  ;;  %v1482_v23 = vld [vmem:[%s3740_s26 + $0x600] sm:$0xff]  ;;  %v1388_v20 = vld [vmem:[%s3740_s26 + $0x310] sm:$0xff] }
 0x328   : > { %v2510_v25 = vpack.c.bf16 %v1490_v24, %v1482_v23  ;;  %v1396_v21 = vld [vmem:[%s3740_s26 + $0x350] sm:$0xff]  ;;  %v1413_v23 = vld [vmem:[%s3740_s26 + $0x3d8] sm:$0xff] }
 0x329   : > { %v2550_v24 = vpack.c.bf16 %v1396_v21, %v1388_v20  ;;  %v1540_v20 = vld [vmem:[%s3740_s26 + $0x7d0] sm:$0xff] }
 0x32a   : > { %2471 = vmatpush1.bf16.msra.mxu0 %v2470_v26  ;;  %v1499_v26 = vld [vmem:[%s3740_s26 + $0x688] sm:$0xff] }
 0x32b   : > { %2473 = vmatprep.subr.bf16.mxu0 %v2472_v29  ;;  %v2512_v28 = vpack.c.bf16 %v1507_v27, %v1499_v26  ;;  %v1498_v29 = vld [vmem:[%s3740_s26 + $0x680] sm:$0xff]  ;;  %v1404_v26 = vld [vmem:[%s3740_s26 + $0x390] sm:$0xff] }
 0x32c   : > { %v2514_v31 = vpack.c.bf16 %v1506_v30, %v1498_v29  ;;  %v1412_v27 = vld [vmem:[%s3740_s26 + $0x3d0] sm:$0xff]  ;;  %v1429_v29 = vld [vmem:[%s3740_s26 + $0x458] sm:$0xff] }
 0x32d   : > { %v2554_v30 = vpack.c.bf16 %v1412_v27, %v1404_v26  ;;  %v1305_v26 = vld [vmem:[%s3740_s26 + $0x78] sm:$0xff] }
 0x32e   : > { %2475 = vmatpush1.bf16.msra.mxu0 %v2474_v32  ;;  %v1515_v32 = vld [vmem:[%s3740_s26 + $0x708] sm:$0xff] }
 0x32f   : > { %2477 = vmatprep.subr.bf16.mxu0 %v2476_v35  ;;  %v2516_v34 = vpack.c.bf16 %v1523_v33, %v1515_v32  ;;  %v1514_v35 = vld [vmem:[%s3740_s26 + $0x700] sm:$0xff]  ;;  %v1420_v32 = vld [vmem:[%s3740_s26 + $0x410] sm:$0xff] }
 0x330   : > { %v2518_v37 = vpack.c.bf16 %v1522_v36, %v1514_v35  ;;  %v1428_v33 = vld [vmem:[%s3740_s26 + $0x450] sm:$0xff]  ;;  %v1445_v35 = vld [vmem:[%s3740_s26 + $0x4d8] sm:$0xff] }
 0x331   : > { %v2558_v36 = vpack.c.bf16 %v1428_v33, %v1420_v32  ;;  %v1302_v32 = vld [vmem:[%s3740_s26 + $0x60] sm:$0xff]  ;;  %v1296_v33 = vld [vmem:[%s3740_s26 + $0x30] sm:$0xff] }
 0x332   : > { %2479 = vmatpush1.bf16.msra.mxu0 %v2478_v38  ;;  %v1060_v38 = vld [vmem:[%s630_s7] sm:$0x3] }
 0x333   : > { %2481 = vmatprep.subr.bf16.mxu0 %v2480_v41  ;;  %v1069_v39 = vrot.slane %v1060_v38, %v3881_v10  ;;  %v1065_v40 = vrot.slane %v1060_v38, %v3886_v12  ;;  %v1292_v41 = vld [vmem:[%s3740_s26 + $0x10] sm:$0xff] }
 0x334   : > { %v2526_v48 = vpack.c.bf16 %v1300_v42, %v1292_v41  ;;  %v1436_v38 = vld [vmem:[%s3740_s26 + $0x490] sm:$0xff]  ;;  %v1461_v41 = vld [vmem:[%s3740_s26 + $0x558] sm:$0xff] }
 0x336   : > { %2483 = vmatpush1.bf16.msra.mxu0 %v2482_v44  ;;  %v1309_v44 = vld [vmem:[%s3740_s26 + $0x98] sm:$0xff] }
 0x337   : > { %2485 = vmatprep.subr.bf16.mxu0 %v2484_v47 }
 0x33a   : > { %2487 = vmatpush1.bf16.msra.mxu0 %v2486_v50  ;;  %v2528_v50 = vpack.c.bf16 %v1317_v45, %v1309_v44  ;;  %v1452_v44 = vld [vmem:[%s3740_s26 + $0x510] sm:$0xff] }
 0x33b   : > { %2489 = vmatprep.subr.bf16.mxu0 %v2488_v53  ;;  %v1325_v53 = vld [vmem:[%s3740_s26 + $0x118] sm:$0xff]  ;;  %v1460_v45 = vld [vmem:[%s3740_s26 + $0x550] sm:$0xff] }
 0x33e   : > { %2491 = vmatpush1.bf16.msra.mxu0 %v2490_v56  ;;  %v2532_v56 = vpack.c.bf16 %v1333_v54, %v1325_v53  ;;  %v1493_v53 = vld [vmem:[%s3740_s26 + $0x658] sm:$0xff] }
 0x33f   : > { %2493 = vmatprep.subr.bf16.mxu0 %v2492_v59  ;;  %v1341_v59 = vld [vmem:[%s3740_s26 + $0x198] sm:$0xff] }
 0x342   : > { %2495 = vmatpush1.bf16.msra.mxu0 %v2494_v62  ;;  %v2536_v62 = vpack.c.bf16 %v1349_v60, %v1341_v59  ;;  %v1509_v59 = vld [vmem:[%s3740_s26 + $0x6d8] sm:$0xff] }
 0x343   : > { %2497 = vmatprep.subr.bf16.mxu0 %v2496_v1  ;;  %v1357_v1 = vld [vmem:[%s3740_s26 + $0x218] sm:$0xff] }
 0x346   : > { %2499 = vmatpush1.bf16.msra.mxu0 %v2498_v4  ;;  %v2540_v4 = vpack.c.bf16 %v1365_v2, %v1357_v1  ;;  %v1525_v1 = vld [vmem:[%s3740_s26 + $0x758] sm:$0xff] }
 0x347   : > { %2501 = vmatprep.subr.bf16.mxu0 %v2500_v7  ;;  %v1373_v7 = vld [vmem:[%s3740_s26 + $0x298] sm:$0xff] }
 0x34a   : > { %2503 = vmatpush1.bf16.msra.mxu0 %v2502_v13  ;;  %v2544_v13 = vpack.c.bf16 %v1381_v8, %v1373_v7  ;;  %v1531_v7 = vld [vmem:[%s3740_s26 + $0x788] sm:$0xff] }
 0x34b   : > { %2505 = vmatprep.subr.bf16.mxu0 %v2504_v16  ;;  %v1389_v16 = vld [vmem:[%s3740_s26 + $0x318] sm:$0xff]  ;;  %v1539_v8 = vld [vmem:[%s3740_s26 + $0x7c8] sm:$0xff] }
 0x34e   : > { %2507 = vmatpush1.bf16.msra.mxu0 %v2506_v19  ;;  %v2548_v19 = vpack.c.bf16 %v1397_v17, %v1389_v16  ;;  %v1538_v16 = vld [vmem:[%s3740_s26 + $0x7c0] sm:$0xff] }
 0x34f   : > { %2509 = vmatprep.subr.bf16.mxu0 %v2508_v22  ;;  %v1405_v22 = vld [vmem:[%s3740_s26 + $0x398] sm:$0xff] }
 0x352   : > { %2511 = vmatpush1.bf16.msra.mxu0 %v2510_v25  ;;  %v2552_v25 = vpack.c.bf16 %v1413_v23, %v1405_v22  ;;  %v1295_v22 = vld [vmem:[%s3740_s26 + $0x28] sm:$0xff] }
 0x353   : > { %2513 = vmatprep.subr.bf16.mxu0 %v2512_v28  ;;  %v1421_v28 = vld [vmem:[%s3740_s26 + $0x418] sm:$0xff]  ;;  %v1303_v23 = vld [vmem:[%s3740_s26 + $0x68] sm:$0xff] }
 0x356   : > { %2515 = vmatpush1.bf16.msra.mxu0 %v2514_v31  ;;  %v2556_v31 = vpack.c.bf16 %v1429_v29, %v1421_v28  ;;  %v1207_v28 = vld [vmem:[%s648_s29] sm:$0x3] }
 0x357   : > { %2517 = vmatprep.subr.bf16.mxu0 %v2516_v34  ;;  %v1437_v34 = vld [vmem:[%s3740_s26 + $0x498] sm:$0xff]  ;;  %v1216_v29 = vrot.slane %v1207_v28, %v3881_v10 }
 0x35a   : > { %2519 = vmatpush1.bf16.msra.mxu0 %v2518_v37  ;;  %v2560_v37 = vpack.c.bf16 %v1445_v35, %v1437_v34  ;;  %v1304_v34 = vld [vmem:[%s3740_s26 + $0x70] sm:$0xff] }
 0x3f4   : > { %v1138_v43 = vpop.f32.mrb[2].mxu0 }
 0x3f5   : > { %v1140_v46 = vpop.f32.mrb[3].mxu0  ;;  %v1139_v49 = vadd.f32 %v1138_v43, %v1065_v40  ;;  %v1453_v40 = vld [vmem:[%s3740_s26 + $0x518] sm:$0xff] }
 0x3f6   : > { %v1141_v47 = vadd.f32 %v1140_v46, %v1069_v39  ;;  %v1444_v39 = vld [vmem:[%s3740_s26 + $0x4d0] sm:$0xff]  ;;  %v2564_v43 = vpack.c.bf16 %v1461_v41, %v1453_v40  ;;  %v1469_v46 = vld [vmem:[%s3740_s26 + $0x598] sm:$0xff] }
 0x3f7   : > { %v2562_v42 = vpack.c.bf16 %v1444_v39, %v1436_v38  ;;  %v1319_v38 = vld [vmem:[%s3740_s26 + $0xe8] sm:$0xff]  ;;  %v1313_v39 = vld [vmem:[%s3740_s26 + $0xb8] sm:$0xff] }
 0x3f8   : > { %1283 = vmatprep.mubr.f32.mxu1 %v1141_v47  ;;  %v1477_v47 = vld [vmem:[%s3740_s26 + $0x5d8] sm:$0xff] }
 0x3f9   : > { %1284 = vmatmul.mubr.f32.vlgmr.msra.gmra.mrb[2].mxu1 %v1139_v49  ;;  %v2568_v49 = vpack.c.bf16 %v1477_v47, %v1469_v46  ;;  %v1321_v40 = vld [vmem:[%s3740_s26 + $0xf8] sm:$0xff]  ;;  %v1312_v47 = vld [vmem:[%s3740_s26 + $0xb0] sm:$0xff] }
 0x3fa   : > { %2527 = vmatpush1.bf16.msra.mxu1 %v2526_v48  ;;  %v2566_v48 = vpack.c.bf16 %v1460_v45, %v1452_v44  ;;  %v1310_v44 = vld [vmem:[%s3740_s26 + $0xa0] sm:$0xff] }
 0x3fb   : > { %2529 = vmatprep.subr.bf16.mxu1 %v2528_v50  ;;  %v1468_v50 = vld [vmem:[%s3740_s26 + $0x590] sm:$0xff]  ;;  %v1318_v45 = vld [vmem:[%s3740_s26 + $0xe0] sm:$0xff] }
 0x3fc   : > { %v2570_v54 = vpack.c.bf16 %v1476_v51, %v1468_v50  ;;  %v2656_v51 = vpack.c.bf16 %v1321_v40, %v1313_v39  ;;  %v1399_v39 = vld [vmem:[%s3740_s26 + $0x368] sm:$0xff]  ;;  %v1393_v40 = vld [vmem:[%s3740_s26 + $0x338] sm:$0xff] }
 0x3fe   : > { %2531 = vmatpush1.bf16.msra.mxu1 %v2530_v55  ;;  %v2572_v55 = vpack.c.bf16 %v1493_v53, %v1485_v52  ;;  %v1335_v52 = vld [vmem:[%s3740_s26 + $0x168] sm:$0xff]  ;;  %v1329_v53 = vld [vmem:[%s3740_s26 + $0x138] sm:$0xff] }
 0x3ff   : > { %2533 = vmatprep.subr.bf16.mxu1 %v2532_v56  ;;  %v1484_v56 = vld [vmem:[%s3740_s26 + $0x610] sm:$0xff] }
 0x400   : > { %v2574_v60 = vpack.c.bf16 %v1492_v57, %v1484_v56  ;;  %v1326_v57 = vld [vmem:[%s3740_s26 + $0x120] sm:$0xff] }
 0x402   : > { %2535 = vmatpush1.bf16.msra.mxu1 %v2534_v61  ;;  %v2576_v61 = vpack.c.bf16 %v1509_v59, %v1501_v58  ;;  %v1334_v58 = vld [vmem:[%s3740_s26 + $0x160] sm:$0xff] }
 0x403   : > { %2537 = vmatprep.subr.bf16.mxu1 %v2536_v62  ;;  %v1500_v62 = vld [vmem:[%s3740_s26 + $0x690] sm:$0xff] }
 0x404   : > { %v2578_v2 = vpack.c.bf16 %v1508_v63, %v1500_v62  ;;  %v1336_v62 = vld [vmem:[%s3740_s26 + $0x170] sm:$0xff]  ;;  %v1343_v63 = vld [vmem:[%s3740_s26 + $0x1a8] sm:$0xff] }
 0x406   : > { %2539 = vmatpush1.bf16.msra.mxu1 %v2538_v3  ;;  %v2580_v3 = vpack.c.bf16 %v1525_v1, %v1517_v0  ;;  %v1351_v0 = vld [vmem:[%s3740_s26 + $0x1e8] sm:$0xff]  ;;  %v1345_v1 = vld [vmem:[%s3740_s26 + $0x1b8] sm:$0xff] }
 0x407   : > { %2541 = vmatprep.subr.bf16.mxu1 %v2540_v4  ;;  %v1516_v4 = vld [vmem:[%s3740_s26 + $0x710] sm:$0xff] }
 0x408   : > { %v2582_v6 = vpack.c.bf16 %v1524_v5, %v1516_v4  ;;  %v1342_v5 = vld [vmem:[%s3740_s26 + $0x1a0] sm:$0xff] }
 0x40a   : > { %2543 = vmatpush1.bf16.msra.mxu1 %v2542_v11  ;;  %v1533_v11 = vld [vmem:[%s3740_s26 + $0x798] sm:$0xff] }
 0x40b   : > { %2545 = vmatprep.subr.bf16.mxu1 %v2544_v13  ;;  %v2520_v13 = vpack.c.bf16 %v1539_v8, %v1531_v7  ;;  %v2584_v17 = vpack.c.bf16 %v1541_v14, %v1533_v11  ;;  %v2600_v7 = vpack.c.bf16 %v1351_v0, %v1343_v63  ;;  %v1344_v11 = vld [vmem:[%s3740_s26 + $0x1b0] sm:$0xff]  ;;  %v1359_v14 = vld [vmem:[%s3740_s26 + $0x228] sm:$0xff] }
 0x40c   : > { %v1423_v63 = vld [vmem:[%s3740_s26 + $0x428] sm:$0xff] }
 0x40d   : > { %2521 = vmatprep.subr.bf16.mxu0 %v2520_v13  ;;  %v1352_v13 = vld [vmem:[%s3740_s26 + $0x1f0] sm:$0xff]  ;;  %v1431_v0 = vld [vmem:[%s3740_s26 + $0x468] sm:$0xff] }
 0x40e   : > { %2547 = vmatpush1.bf16.msra.mxu1 %v2546_v18  ;;  %v2522_v18 = vpack.c.bf16 %v1538_v16, %v1530_v15  ;;  %v1367_v15 = vld [vmem:[%s3740_s26 + $0x268] sm:$0xff]  ;;  %v1361_v16 = vld [vmem:[%s3740_s26 + $0x238] sm:$0xff] }
 0x40f   : > { %2549 = vmatprep.subr.bf16.mxu1 %v2548_v19  ;;  %v1532_v19 = vld [vmem:[%s3740_s26 + $0x790] sm:$0xff] }
 0x410   : > { %v2586_v21 = vpack.c.bf16 %v1540_v20, %v1532_v19  ;;  %2523 = vmatpush1.bf16.msra.mxu0 %v2522_v18  ;;  %v2666_v19 = vpack.c.bf16 %v1352_v13, %v1344_v11  ;;  %v1358_v20 = vld [vmem:[%s3740_s26 + $0x220] sm:$0xff]  ;;  %v1424_v11 = vld [vmem:[%s3740_s26 + $0x430] sm:$0xff] }
 0x411   : > { %v1432_v13 = vld [vmem:[%s3740_s26 + $0x470] sm:$0xff] }
 0x412   : > { %2551 = vmatpush1.bf16.msra.mxu1 %v2550_v24  ;;  %v1297_v24 = vld [vmem:[%s3740_s26 + $0x38] sm:$0xff] }
 0x413   : > { %2553 = vmatprep.subr.bf16.mxu1 %v2552_v25  ;;  %v2588_v25 = vpack.c.bf16 %v1303_v23, %v1295_v22  ;;  %v2652_v27 = vpack.c.bf16 %v1305_v26, %v1297_v24  ;;  %v2604_v22 = vpack.c.bf16 %v1367_v15, %v1359_v14  ;;  %v1360_v24 = vld [vmem:[%s3740_s26 + $0x230] sm:$0xff]  ;;  %v1375_v26 = vld [vmem:[%s3740_s26 + $0x2a8] sm:$0xff] }
 0x414   : > { %v1439_v14 = vld [vmem:[%s3740_s26 + $0x4a8] sm:$0xff] }
 0x415   : > { %2589 = vmatprep.subr.bf16.mxu0 %v2588_v25  ;;  %v1368_v25 = vld [vmem:[%s3740_s26 + $0x270] sm:$0xff]  ;;  %v1447_v15 = vld [vmem:[%s3740_s26 + $0x4e8] sm:$0xff] }
 0x416   : > { %2555 = vmatpush1.bf16.msra.mxu1 %v2554_v30  ;;  %v1294_v30 = vld [vmem:[%s3740_s26 + $0x20] sm:$0xff] }
 0x417   : > { %2557 = vmatprep.subr.bf16.mxu1 %v2556_v31  ;;  %v1212_v31 = vrot.slane %v1207_v28, %v3886_v12  ;;  %v1377_v28 = vld [vmem:[%s3740_s26 + $0x2b8] sm:$0xff] }
 0x41a   : > { %2559 = vmatpush1.bf16.msra.mxu1 %v2558_v36  ;;  %v1311_v36 = vld [vmem:[%s3740_s26 + $0xa8] sm:$0xff] }
 0x41b   : > { %2561 = vmatprep.subr.bf16.mxu1 %v2560_v37  ;;  %v2592_v50 = vpack.c.bf16 %v1319_v38, %v1311_v36  ;;  %v1376_v36 = vld [vmem:[%s3740_s26 + $0x2b0] sm:$0xff]  ;;  %v1391_v38 = vld [vmem:[%s3740_s26 + $0x328] sm:$0xff] }
 0x41e   : > { %2563 = vmatpush1.bf16.msra.mxu1 %v2562_v42  ;;  %v2590_v42 = vpack.c.bf16 %v1302_v32, %v1294_v30  ;;  %v1374_v32 = vld [vmem:[%s3740_s26 + $0x2a0] sm:$0xff] }
 0x41f   : > { %2565 = vmatprep.subr.bf16.mxu1 %v2564_v43  ;;  %v2654_v43 = vpack.c.bf16 %v1304_v34, %v1296_v33  ;;  %v1382_v33 = vld [vmem:[%s3740_s26 + $0x2e0] sm:$0xff] }
 0x422   : > { %2567 = vmatpush1.bf16.msra.mxu1 %v2566_v48  ;;  %v1320_v48 = vld [vmem:[%s3740_s26 + $0xf0] sm:$0xff] }
 0x423   : > { %2569 = vmatprep.subr.bf16.mxu1 %v2568_v49  ;;  %v1327_v49 = vld [vmem:[%s3740_s26 + $0x128] sm:$0xff]  ;;  %v2658_v56 = vpack.c.bf16 %v1320_v48, %v1312_v47  ;;  %v2612_v47 = vpack.c.bf16 %v1399_v39, %v1391_v38 }
 0x424   : > { %v2596_v59 = vpack.c.bf16 %v1335_v52, %v1327_v49  ;;  %v1392_v49 = vld [vmem:[%s3740_s26 + $0x330] sm:$0xff]  ;;  %v1415_v52 = vld [vmem:[%s3740_s26 + $0x3e8] sm:$0xff] }
 0x425   : > { %v1471_v38 = vld [vmem:[%s3740_s26 + $0x5a8] sm:$0xff] }
 0x426   : > { %2571 = vmatpush1.bf16.msra.mxu1 %v2570_v54  ;;  %v1337_v54 = vld [vmem:[%s3740_s26 + $0x178] sm:$0xff]  ;;  %v1479_v39 = vld [vmem:[%s3740_s26 + $0x5e8] sm:$0xff] }
 0x427   : > { %2573 = vmatprep.subr.bf16.mxu1 %v2572_v55  ;;  %v2594_v55 = vpack.c.bf16 %v1318_v45, %v1310_v44  ;;  %v1390_v44 = vld [vmem:[%s3740_s26 + $0x320] sm:$0xff] }
 0x428   : > { %v1398_v45 = vld [vmem:[%s3740_s26 + $0x360] sm:$0xff] }
 0x42a   : > { %2575 = vmatpush1.bf16.msra.mxu1 %v2574_v60  ;;  %v2660_v60 = vpack.c.bf16 %v1337_v54, %v1329_v53  ;;  %v1409_v53 = vld [vmem:[%s3740_s26 + $0x3b8] sm:$0xff] }
 0x42b   : > { %2577 = vmatprep.subr.bf16.mxu1 %v2576_v61  ;;  %v1328_v61 = vld [vmem:[%s3740_s26 + $0x130] sm:$0xff]  ;;  %v1417_v54 = vld [vmem:[%s3740_s26 + $0x3f8] sm:$0xff] }
 0x42c   : > { %v2662_v4 = vpack.c.bf16 %v1336_v62, %v1328_v61  ;;  %v1408_v61 = vld [vmem:[%s3740_s26 + $0x3b0] sm:$0xff] }
 0x42d   : > { %v1416_v62 = vld [vmem:[%s3740_s26 + $0x3f0] sm:$0xff] }
 0x42e   : > { %2579 = vmatpush1.bf16.msra.mxu1 %v2578_v2  ;;  %v1353_v2 = vld [vmem:[%s3740_s26 + $0x1f8] sm:$0xff] }
 0x42f   : > { %2581 = vmatprep.subr.bf16.mxu1 %v2580_v3  ;;  %v2598_v3 = vpack.c.bf16 %v1334_v58, %v1326_v57  ;;  %v2664_v8 = vpack.c.bf16 %v1353_v2, %v1345_v1  ;;  %v1406_v57 = vld [vmem:[%s3740_s26 + $0x3a0] sm:$0xff]  ;;  %v1425_v1 = vld [vmem:[%s3740_s26 + $0x438] sm:$0xff] }
 0x430   : > { %v1414_v58 = vld [vmem:[%s3740_s26 + $0x3e0] sm:$0xff]  ;;  %v1433_v2 = vld [vmem:[%s3740_s26 + $0x478] sm:$0xff] }
 0x432   : > { %2583 = vmatpush1.bf16.msra.mxu1 %v2582_v6  ;;  %v1350_v6 = vld [vmem:[%s3740_s26 + $0x1e0] sm:$0xff] }
 0x433   : > { %2585 = vmatprep.subr.bf16.mxu1 %v2584_v17  ;;  %v1369_v17 = vld [vmem:[%s3740_s26 + $0x278] sm:$0xff]  ;;  %v2602_v18 = vpack.c.bf16 %v1350_v6, %v1342_v5  ;;  %v1422_v5 = vld [vmem:[%s3740_s26 + $0x420] sm:$0xff] }
 0x434   : > { %v2668_v23 = vpack.c.bf16 %v1369_v17, %v1361_v16  ;;  %v1430_v6 = vld [vmem:[%s3740_s26 + $0x460] sm:$0xff]  ;;  %v1441_v16 = vld [vmem:[%s3740_s26 + $0x4b8] sm:$0xff] }
 0x435   : > { %v1449_v17 = vld [vmem:[%s3740_s26 + $0x4f8] sm:$0xff] }
 0x436   : > { %2587 = vmatpush1.bf16.msra.mxu1 %v2586_v21  ;;  %v1366_v21 = vld [vmem:[%s3740_s26 + $0x260] sm:$0xff] }
 0x437   : > { %2653 = vmatprep.subr.bf16.mxu1 %v2652_v27  ;;  %v1383_v27 = vld [vmem:[%s3740_s26 + $0x2e8] sm:$0xff]  ;;  %v2606_v30 = vpack.c.bf16 %v1366_v21, %v1358_v20  ;;  %v1438_v20 = vld [vmem:[%s3740_s26 + $0x4a0] sm:$0xff] }
 0x438   : > { %v2608_v34 = vpack.c.bf16 %v1383_v27, %v1375_v26  ;;  %v1446_v21 = vld [vmem:[%s3740_s26 + $0x4e0] sm:$0xff]  ;;  %v1455_v26 = vld [vmem:[%s3740_s26 + $0x528] sm:$0xff] }
 0x439   : > { %v1463_v27 = vld [vmem:[%s3740_s26 + $0x568] sm:$0xff] }
 0x4cc   : > { %v1285_v35 = vpop.f32.mrb[2].mxu1 }
 0x4cd   : > { %v1287_v37 = vpop.f32.mrb[3].mxu1  ;;  %v4112_v46 = vadd.f32 %v1285_v35, %v1212_v31  ;;  %v2670_v31 = vpack.c.bf16 %v1368_v25, %v1360_v24  ;;  %v1440_v24 = vld [vmem:[%s3740_s26 + $0x4b0] sm:$0xff] }
 0x4ce   : > { %v1288_v41 = vadd.f32 %v1287_v37, %v1216_v29  ;;  %v1385_v29 = vld [vmem:[%s3740_s26 + $0x2f8] sm:$0xff]  ;;  %v1384_v37 = vld [vmem:[%s3740_s26 + $0x2f0] sm:$0xff] }
 0x4cf   : > { %v2672_v35 = vpack.c.bf16 %v1385_v29, %v1377_v28  ;;  %v1448_v25 = vld [vmem:[%s3740_s26 + $0x4f0] sm:$0xff]  ;;  %v1457_v28 = vld [vmem:[%s3740_s26 + $0x538] sm:$0xff] }
 0x4d0   : > { %1652 = vmatprep.mubr.f32.mxu0 %v1288_v41  ;;  %1723 = vmatprep.mubr.f32.mxu1 %v1288_v41  ;;  %v1465_v29 = vld [vmem:[%s3740_s26 + $0x578] sm:$0xff] }
 0x4d1   : > { %1653 = vmatmul.mubr.f32.vlgmr.msra.gmra.mrb[4].mxu0 %v4112_v46  ;;  %1724 = vmatmul.mubr.f32.vlgmr.msra.gmra.mrb[4].mxu1 %v4112_v46 }
 0x4d2   : > { %2591 = vmatpush1.bf16.msra.mxu0 %v2590_v42  ;;  %2655 = vmatpush1.bf16.msra.mxu1 %v2654_v43  ;;  %v2610_v42 = vpack.c.bf16 %v1382_v33, %v1374_v32  ;;  %v2674_v43 = vpack.c.bf16 %v1384_v37, %v1376_v36  ;;  %v1454_v32 = vld [vmem:[%s3740_s26 + $0x520] sm:$0xff]  ;;  %v1456_v36 = vld [vmem:[%s3740_s26 + $0x530] sm:$0xff] }
 0x4d3   : > { %1794 = vmatprep.mubr.f32.mxu0 %v1288_v41  ;;  %1865 = vmatprep.mubr.f32.mxu1 %v1288_v41  ;;  %v1401_v41 = vld [vmem:[%s3740_s26 + $0x378] sm:$0xff]  ;;  %v1462_v33 = vld [vmem:[%s3740_s26 + $0x560] sm:$0xff]  ;;  %v1464_v37 = vld [vmem:[%s3740_s26 + $0x570] sm:$0xff] }
 0x4d4   : > { %2593 = vmatprep.subr.bf16.mxu0 %v2592_v50  ;;  %2657 = vmatprep.subr.bf16.mxu1 %v2656_v51  ;;  %v2676_v48 = vpack.c.bf16 %v1401_v41, %v1393_v40  ;;  %v1400_v50 = vld [vmem:[%s3740_s26 + $0x370] sm:$0xff]  ;;  %v1407_v51 = vld [vmem:[%s3740_s26 + $0x3a8] sm:$0xff]  ;;  %v1473_v40 = vld [vmem:[%s3740_s26 + $0x5b8] sm:$0xff] }
 0x4d5   : > { %v1481_v41 = vld [vmem:[%s3740_s26 + $0x5f8] sm:$0xff] }
 0x4d6   : > { %2595 = vmatpush1.bf16.msra.mxu0 %v2594_v55  ;;  %2659 = vmatpush1.bf16.msra.mxu1 %v2658_v56  ;;  %v2614_v55 = vpack.c.bf16 %v1398_v45, %v1390_v44  ;;  %v2678_v56 = vpack.c.bf16 %v1400_v50, %v1392_v49  ;;  %v1470_v44 = vld [vmem:[%s3740_s26 + $0x5a0] sm:$0xff]  ;;  %v1472_v49 = vld [vmem:[%s3740_s26 + $0x5b0] sm:$0xff] }
 0x4d7   : > { %2597 = vmatprep.subr.bf16.mxu0 %v2596_v59  ;;  %2661 = vmatprep.subr.bf16.mxu1 %v2660_v60  ;;  %v2616_v59 = vpack.c.bf16 %v1415_v52, %v1407_v51  ;;  %v2680_v60 = vpack.c.bf16 %v1417_v54, %v1409_v53  ;;  %v1478_v45 = vld [vmem:[%s3740_s26 + $0x5e0] sm:$0xff]  ;;  %v1480_v50 = vld [vmem:[%s3740_s26 + $0x5f0] sm:$0xff]  ;;  %v1487_v51 = vld [vmem:[%s3740_s26 + $0x628] sm:$0xff] }
 0x4d8   : > { %v1495_v52 = vld [vmem:[%s3740_s26 + $0x668] sm:$0xff]  ;;  %v1489_v53 = vld [vmem:[%s3740_s26 + $0x638] sm:$0xff] }
 0x4d9   : > { %v1497_v54 = vld [vmem:[%s3740_s26 + $0x678] sm:$0xff] }
 0x4da   : > { %2599 = vmatpush1.bf16.msra.mxu0 %v2598_v3  ;;  %2663 = vmatpush1.bf16.msra.mxu1 %v2662_v4  ;;  %v2618_v3 = vpack.c.bf16 %v1414_v58, %v1406_v57  ;;  %v2682_v4 = vpack.c.bf16 %v1416_v62, %v1408_v61  ;;  %v1486_v57 = vld [vmem:[%s3740_s26 + $0x620] sm:$0xff]  ;;  %v1488_v61 = vld [vmem:[%s3740_s26 + $0x630] sm:$0xff] }
 0x4db   : > { %2601 = vmatprep.subr.bf16.mxu0 %v2600_v7  ;;  %2665 = vmatprep.subr.bf16.mxu1 %v2664_v8  ;;  %v2620_v7 = vpack.c.bf16 %v1431_v0, %v1423_v63  ;;  %v2684_v8 = vpack.c.bf16 %v1433_v2, %v1425_v1  ;;  %v1494_v58 = vld [vmem:[%s3740_s26 + $0x660] sm:$0xff]  ;;  %v1496_v62 = vld [vmem:[%s3740_s26 + $0x670] sm:$0xff]  ;;  %v1503_v63 = vld [vmem:[%s3740_s26 + $0x6a8] sm:$0xff] }
 0x4dc   : > { %v1511_v0 = vld [vmem:[%s3740_s26 + $0x6e8] sm:$0xff]  ;;  %v1505_v1 = vld [vmem:[%s3740_s26 + $0x6b8] sm:$0xff] }
 0x4dd   : > { %v1513_v2 = vld [vmem:[%s3740_s26 + $0x6f8] sm:$0xff] }
 0x4de   : > { %2603 = vmatpush1.bf16.msra.mxu0 %v2602_v18  ;;  %2667 = vmatpush1.bf16.msra.mxu1 %v2666_v19  ;;  %v2622_v18 = vpack.c.bf16 %v1430_v6, %v1422_v5  ;;  %v2686_v19 = vpack.c.bf16 %v1432_v13, %v1424_v11  ;;  %v1502_v5 = vld [vmem:[%s3740_s26 + $0x6a0] sm:$0xff]  ;;  %v1504_v11 = vld [vmem:[%s3740_s26 + $0x6b0] sm:$0xff] }
 0x4df   : > { %2605 = vmatprep.subr.bf16.mxu0 %v2604_v22  ;;  %2669 = vmatprep.subr.bf16.mxu1 %v2668_v23  ;;  %v2624_v22 = vpack.c.bf16 %v1447_v15, %v1439_v14  ;;  %v2688_v23 = vpack.c.bf16 %v1449_v17, %v1441_v16  ;;  %v1510_v6 = vld [vmem:[%s3740_s26 + $0x6e0] sm:$0xff]  ;;  %v1512_v13 = vld [vmem:[%s3740_s26 + $0x6f0] sm:$0xff]  ;;  %v1519_v14 = vld [vmem:[%s3740_s26 + $0x728] sm:$0xff] }
 0x4e0   : > { %v1527_v15 = vld [vmem:[%s3740_s26 + $0x768] sm:$0xff]  ;;  %v1521_v16 = vld [vmem:[%s3740_s26 + $0x738] sm:$0xff] }
 0x4e1   : > { %v1529_v17 = vld [vmem:[%s3740_s26 + $0x778] sm:$0xff] }
 0x4e2   : > { %2607 = vmatpush1.bf16.msra.mxu0 %v2606_v30  ;;  %2671 = vmatpush1.bf16.msra.mxu1 %v2670_v31  ;;  %v2626_v30 = vpack.c.bf16 %v1446_v21, %v1438_v20  ;;  %v2690_v31 = vpack.c.bf16 %v1448_v25, %v1440_v24  ;;  %v1518_v20 = vld [vmem:[%s3740_s26 + $0x720] sm:$0xff]  ;;  %v1520_v24 = vld [vmem:[%s3740_s26 + $0x730] sm:$0xff] }
 0x4e3   : > { %2609 = vmatprep.subr.bf16.mxu0 %v2608_v34  ;;  %2673 = vmatprep.subr.bf16.mxu1 %v2672_v35  ;;  %v2628_v34 = vpack.c.bf16 %v1463_v27, %v1455_v26  ;;  %v2692_v35 = vpack.c.bf16 %v1465_v29, %v1457_v28  ;;  %v1526_v21 = vld [vmem:[%s3740_s26 + $0x760] sm:$0xff]  ;;  %v1528_v25 = vld [vmem:[%s3740_s26 + $0x770] sm:$0xff]  ;;  %v1535_v26 = vld [vmem:[%s3740_s26 + $0x7a8] sm:$0xff] }
 0x4e4   : > { %v1543_v27 = vld [vmem:[%s3740_s26 + $0x7e8] sm:$0xff]  ;;  %v1537_v28 = vld [vmem:[%s3740_s26 + $0x7b8] sm:$0xff] }
 0x4e5   : > { %v1545_v29 = vld [vmem:[%s3740_s26 + $0x7f8] sm:$0xff] }
 0x4e6   : > { %2611 = vmatpush1.bf16.msra.mxu0 %v2610_v42  ;;  %2675 = vmatpush1.bf16.msra.mxu1 %v2674_v43  ;;  %v2630_v42 = vpack.c.bf16 %v1462_v33, %v1454_v32  ;;  %v2694_v43 = vpack.c.bf16 %v1464_v37, %v1456_v36  ;;  %v1534_v32 = vld [vmem:[%s3740_s26 + $0x7a0] sm:$0xff]  ;;  %v2648_v33 = vpack.c.bf16 %v1543_v27, %v1535_v26  ;;  %v1536_v36 = vld [vmem:[%s3740_s26 + $0x7b0] sm:$0xff] }
 0x4e7   : > { %2613 = vmatprep.subr.bf16.mxu0 %v2612_v47  ;;  %2677 = vmatprep.subr.bf16.mxu1 %v2676_v48  ;;  %v2632_v47 = vpack.c.bf16 %v1479_v39, %v1471_v38  ;;  %v2696_v48 = vpack.c.bf16 %v1481_v41, %v1473_v40  ;;  %v1544_v37 = vld [vmem:[%s3740_s26 + $0x7f0] sm:$0xff]  ;;  %v1558_v40 = vsub.s32 2, %v3878_v9  ;;  %v1546_v41 = vld [vmem:[%s666_s24] sm:$0xff] }
 0x4e8   : > { %v2714_v39 = vpack.c.bf16 %v1544_v37, %v1536_v36 }
 0x4ea   : > { %2615 = vmatpush1.bf16.msra.mxu0 %v2614_v55  ;;  %2679 = vmatpush1.bf16.msra.mxu1 %v2678_v56  ;;  %v2634_v55 = vpack.c.bf16 %v1478_v45, %v1470_v44  ;;  %v2698_v56 = vpack.c.bf16 %v1480_v50, %v1472_v49  ;;  %v1562_v44 = vsub.s32 3, %v3878_v9  ;;  %v1551_v45 = vrot.slane %v1546_v41, %v3886_v12 }
 0x4eb   : > { %2617 = vmatprep.subr.bf16.mxu0 %v2616_v59  ;;  %2681 = vmatprep.subr.bf16.mxu1 %v2680_v60  ;;  %v2636_v59 = vpack.c.bf16 %v1495_v52, %v1487_v51  ;;  %v2700_v60 = vpack.c.bf16 %v1497_v54, %v1489_v53 }
 0x4ec   : > { %v1563_v50 = vrot.slane %v1546_v41, %v1562_v44 }
 0x4ee   : > { %2619 = vmatpush1.bf16.msra.mxu0 %v2618_v3  ;;  %2683 = vmatpush1.bf16.msra.mxu1 %v2682_v4  ;;  %v2638_v3 = vpack.c.bf16 %v1494_v58, %v1486_v57  ;;  %v2702_v4 = vpack.c.bf16 %v1496_v62, %v1488_v61 }
 0x4ef   : > { %2621 = vmatprep.subr.bf16.mxu0 %v2620_v7  ;;  %2685 = vmatprep.subr.bf16.mxu1 %v2684_v8  ;;  %v2640_v7 = vpack.c.bf16 %v1511_v0, %v1503_v63  ;;  %v2704_v8 = vpack.c.bf16 %v1513_v2, %v1505_v1  ;;  %v1574_v63 = vsub.s32 6, %v3878_v9  ;;  %v1570_v0 = vsub.s32 5, %v3878_v9 }
 0x4f0   : > { %v1578_v1 = vsub.s32 7, %v3878_v9 }
 0x4f2   : > { %2623 = vmatpush1.bf16.msra.mxu0 %v2622_v18  ;;  %2687 = vmatpush1.bf16.msra.mxu1 %v2686_v19  ;;  %v2642_v18 = vpack.c.bf16 %v1510_v6, %v1502_v5  ;;  %v2706_v19 = vpack.c.bf16 %v1512_v13, %v1504_v11  ;;  %v1579_v5 = vrot.slane %v1546_v41, %v1578_v1 }
 0x4f3   : > { %2625 = vmatprep.subr.bf16.mxu0 %v2624_v22  ;;  %2689 = vmatprep.subr.bf16.mxu1 %v2688_v23  ;;  %v2644_v22 = vpack.c.bf16 %v1527_v15, %v1519_v14  ;;  %v2708_v23 = vpack.c.bf16 %v1529_v17, %v1521_v16 }
 0x4f6   : > { %2627 = vmatpush1.bf16.msra.mxu0 %v2626_v30  ;;  %2691 = vmatpush1.bf16.msra.mxu1 %v2690_v31  ;;  %v2646_v30 = vpack.c.bf16 %v1526_v21, %v1518_v20  ;;  %v2710_v31 = vpack.c.bf16 %v1528_v25, %v1520_v24 }
 0x4f7   : > { %2629 = vmatprep.subr.bf16.mxu0 %v2628_v34  ;;  %2693 = vmatprep.subr.bf16.mxu1 %v2692_v35  ;;  %v2712_v34 = vpack.c.bf16 %v1545_v29, %v1537_v28  ;;  %v1542_v35 = vld [vmem:[%s3740_s26 + $0x7e0] sm:$0xff] }
 0x4f8   : > { %v2650_v38 = vpack.c.bf16 %v1542_v35, %v1534_v32 }
 0x4fa   : > { %2631 = vmatpush1.bf16.msra.mxu0 %v2630_v42  ;;  %2695 = vmatpush1.bf16.msra.mxu1 %v2694_v43  ;;  %v3217_v42 = vmov 1966171168  }
 0x4fb   : > { %2633 = vmatprep.subr.bf16.mxu0 %v2632_v47  ;;  %2697 = vmatprep.subr.bf16.mxu1 %v2696_v48  ;;  %v1885_v43 = vunpack.c.l.s4 %v3217_v42  ;;  %v1559_v47 = vrot.slane %v1546_v41, %v1558_v40  ;;  %v1555_v48 = vrot.slane %v1546_v41, %v3881_v10  ;;  %v1566_v10 = vsub.s32 4, %v3878_v9 }
 0x4fd   : > { %v1886_v49 = vunpack.c.0.s8 %v1885_v43  ;;  %v1567_v2 = vrot.slane %v1546_v41, %v1566_v10 }
 0x4fe   : > { %2635 = vmatpush1.bf16.msra.mxu0 %v2634_v55  ;;  %2699 = vmatpush1.bf16.msra.mxu1 %v2698_v56 }
 0x4ff   : > { %2637 = vmatprep.subr.bf16.mxu0 %v2636_v59  ;;  %2701 = vmatprep.subr.bf16.mxu1 %v2700_v60  ;;  %v1889_v57 = vsub.s32 %v1886_v49, %v3878_v9 }
 0x502   : > { %2639 = vmatpush1.bf16.msra.mxu0 %v2638_v3  ;;  %2703 = vmatpush1.bf16.msra.mxu1 %v2702_v4  ;;  %v1575_v3 = vrot.slane %v1546_v41, %v1574_v63  ;;  %v1571_v4 = vrot.slane %v1546_v41, %v1570_v0 }
 0x503   : > { %2641 = vmatprep.subr.bf16.mxu0 %v2640_v7  ;;  %2705 = vmatprep.subr.bf16.mxu1 %v2704_v8 }
 0x506   : > { %2643 = vmatpush1.bf16.msra.mxu0 %v2642_v18  ;;  %2707 = vmatpush1.bf16.msra.mxu1 %v2706_v19 }
 0x507   : > { %2645 = vmatprep.subr.bf16.mxu0 %v2644_v22  ;;  %2709 = vmatprep.subr.bf16.mxu1 %v2708_v23 }
 0x50a   : > { %2647 = vmatpush1.bf16.msra.mxu0 %v2646_v30  ;;  %2711 = vmatpush1.bf16.msra.mxu1 %v2710_v31 }
 0x50b   : > { %2649 = vmatprep.subr.bf16.mxu0 %v2648_v33  ;;  %2713 = vmatprep.subr.bf16.mxu1 %v2712_v34 }
 0x50e   : > { %2651 = vmatpush1.bf16.msra.mxu0 %v2650_v38  ;;  %2715 = vmatpush1.bf16.msra.mxu1 %v2714_v39 }
 0x511   : > { %1795 = vmatmul.mubr.f32.vlgmr.msra.gmra.mrb[6].mxu0 %v4112_v46  ;;  %1866 = vmatmul.mubr.f32.vlgmr.msra.gmra.mrb[6].mxu1 %v4112_v46 }
 0x5a4   : > { %v1654_v51 = vpop.f32.mrb[4].mxu0  ;;  %v1725_v52 = vpop.f32.mrb[4].mxu1 }
 0x5a5   : > { %v1655_v53 = vadd.f32 %v1654_v51, %v1551_v45  ;;  %v1726_v46 = vadd.f32 %v1725_v52, %v1559_v47  ;;  %v1656_v54 = vpop.f32.mrb[5].mxu0  ;;  %v1727_v55 = vpop.f32.mrb[5].mxu1 }
 0x5a6   : > { %v1657_v56 = vadd.f32 %v1656_v54, %v1555_v48  ;;  %v1728_v58 = vadd.f32 %v1727_v55, %v1563_v50 }
 0x5a8   : > { %v1880_v59 = vcombine.low %v1655_v53, %v1657_v56  ;;  %v1881_v60 = vcombine.low %v1726_v46, %v1728_v58 }
 0x5aa   : > { %v1890_v61 = vrot.slane %v1880_v59, %v1889_v57  ;;  %v1897_v12 = vrot.slane %v1881_v60, %v1889_v57 }
 0x5ac   : > { %v1912_v62 = vcombine.low %v1890_v61, %v1897_v12 }
 0x5ae   : > { %v1920_v21 = vrot.slane %v1912_v62, %v1889_v57 }
 0x5e4   : > { %v1796_v6 = vpop.f32.mrb[6].mxu0  ;;  %v1867_v7 = vpop.f32.mrb[6].mxu1 }
 0x5e5   : > { %v1797_v8 = vadd.f32 %v1796_v6, %v1567_v2  ;;  %v1868_v11 = vadd.f32 %v1867_v7, %v1575_v3  ;;  %v1798_v13 = vpop.f32.mrb[7].mxu0  ;;  %v1869_v14 = vpop.f32.mrb[7].mxu1 }
 0x5e6   : > { %v1799_v15 = vadd.f32 %v1798_v13, %v1571_v4  ;;  %v1870_v16 = vadd.f32 %v1869_v14, %v1579_v5 }
 0x5e8   : > { %v1882_v17 = vcombine.low %v1797_v8, %v1799_v15  ;;  %v1883_v18 = vcombine.low %v1868_v11, %v1870_v16 }
 0x5ea   : > { %v1904_v19 = vrot.slane %v1882_v17, %v1889_v57  ;;  %v1911_v20 = vrot.slane %v1883_v18, %v1889_v57 }
 0x5ec   : > { %v1913_v9 = vcombine.low %v1904_v19, %v1911_v20 }
 0x5ee   : > { %v1927_v22 = vrot.slane %v1913_v9, %v1889_v57 }
 0x5f0   : > { %v1928_v23 = vcombine.low %v1920_v21, %v1927_v22 }
 0x5f2   : > { %1930 = vst [vmem:[%s752_s25] sm:$0xff] %v1928_v23 }
 0x5f3 PF: > { %s4330_s20 = sld [smem:[#allocation26_spill]]  ;;  %s4331_s15 = sld [smem:[#allocation25_spill]] }
 0x5f4   : > { %s4332_s19 = sld [smem:[#allocation27_spill]]  ;;  %s4333_s17 = smov %s3191_s18 }
 0x5f9   : > { %p34_p3 = scmp.ge.s32.totalorder %s4330_s20, 6   ;;  %s4334_s18 = smov %s4331_s15 }
 0x5fb   :  { %36 = sbr.rel (!%p34_p3) target bundleno = 20 (0x14), region = 216 }
 0x602   :  { %1950 = vsyncpa [#allocation3], 1 }
 0x603   :  { %1952 = vsyncpa [#allocation3 + $0x1], 1 }
 0x604   :  { %1953 = vsyncpa [#allocation5], 1 }
 0x605   :  { %1955 = vsyncpa [#allocation5 + $0x1], 1 }
 0x606   :  { %1956 = vsyncpa [#allocation8], 1 }
 0x607   :  { %1958 = vsyncpa [#allocation8 + $0x1], 1 }
 0x608   :  { %1959 = vsyncpa [#allocation11], 1 }
 0x609   :  { %1961 = vsyncpa [#allocation11 + $0x1], 1 }
 0x60a   :  { %1962 = vsyncpa [#allocation14], 1 }
 0x60b   :  { %1964 = vsyncpa [#allocation14 + $0x1], 1 }
 0x60c   :  { %1965 = vsyncpa [#allocation17], 1 }
 0x60d   :  { %1967 = vsyncpa [#allocation17 + $0x1], 1 }

</bundles_post_ra>
